<compile_context>
chip_gen: v7x
topology: tpu7x:2x2x1
jax: 0.10.0
libtpu: 0.0.40
codegen_flags: <defaults>
</compile_context>

<pallas_src>
import jax
import jax.numpy as jnp
from jax.experimental import pallas as pl
from jax.experimental.pallas import tpu as pltpu

# ---- model dims (module defaults: input_size=15960, cls_num=9; the runnable
# ---- example shrinks input_size but keeps it NOT a multiple of 128 so the
# ---- same padding path used for 15960 is exercised). ----
D_IN = 1000        # real module: 15960
H1 = 64
H2 = 16
C = 9

# ---- kernel tiling ----
TM = 128           # batch tile (256 is fine on v6e; re-check VMEM on v7x)
TK = 512           # K tile for the layer-1 reduction (multiple of 128)
H1_PAD = 128       # lane-dense hidden-1
NEG_SLOPE = 0.01   # nn.LeakyReLU default


def _round_up(x, m):
    return (x + m - 1) // m * m


D_PAD = _round_up(D_IN, TK)


def _leaky_relu(x):
    return jnp.where(x > 0, x, NEG_SLOPE * x)


def _sigmoid(x):
    # Robust sigmoid: exp() only ever sees non-positive arguments.
    e = jnp.exp(-jnp.abs(x))
    return jnp.where(x >= 0, 1.0 / (1.0 + e), e / (1.0 + e))


def mlp_kernel(x_ref, w1t_ref, b1_ref, w2_ref, b2_ref, w3_ref, b3_ref,
               o_ref, acc_ref):
    k = pl.program_id(1)

    @pl.when(k == 0)
    def _():
        acc_ref[...] = jnp.zeros_like(acc_ref)

    # Layer-1 partial: (TM, TK) contracted with (H1_PAD, TK) -> (TM, H1_PAD).
    # W1 slab arrives as bf16 (HBM bytes halved); upcast for f32 accumulation.
    acc_ref[...] += jax.lax.dot_general(
        x_ref[...], w1t_ref[...].astype(jnp.float32),
        dimension_numbers=(((1,), (1,)), ((), ())),
        preferred_element_type=jnp.float32)

    @pl.when(k == pl.num_programs(1) - 1)
    def _():
        h1 = _leaky_relu(acc_ref[...] + b1_ref[...])
        h2 = _leaky_relu(
            jnp.dot(h1, w2_ref[...], preferred_element_type=jnp.float32)
            + b2_ref[...])
        logits = (jnp.dot(h2, w3_ref[...], preferred_element_type=jnp.float32)
                  + b3_ref[...])
        o_ref[...] = _sigmoid(logits)


@jax.jit
def classifier_forward(x, params):
    w1t, b1, w2, b2, w3, b3 = params
    b = x.shape[0]
    b_pad = _round_up(b, TM)
    if x.shape[1] != D_PAD or b_pad != b:
        x = jnp.pad(x, ((0, b_pad - b), (0, D_PAD - x.shape[1])))

    grid = (b_pad // TM, D_PAD // TK)
    out = pl.pallas_call(
        mlp_kernel,
        out_shape=jax.ShapeDtypeStruct((b_pad, C), jnp.float32),
        grid_spec=pltpu.PrefetchScalarGridSpec(
            num_scalar_prefetch=0,
            grid=grid,
            in_specs=[
                pl.BlockSpec((TM, TK), lambda i, k: (i, k)),      # x tile
                pl.BlockSpec((H1_PAD, TK), lambda i, k: (0, k)),  # W1^T slab
                pl.BlockSpec((1, H1_PAD), lambda i, k: (0, 0)),   # b1 (resident)
                pl.BlockSpec((H1_PAD, H2), lambda i, k: (0, 0)),  # W2 (resident)
                pl.BlockSpec((1, H2), lambda i, k: (0, 0)),       # b2
                pl.BlockSpec((H2, C), lambda i, k: (0, 0)),       # W3
                pl.BlockSpec((1, C), lambda i, k: (0, 0)),        # b3
            ],
            out_specs=pl.BlockSpec((TM, C), lambda i, k: (i, 0)),
            scratch_shapes=[pltpu.VMEM((TM, H1_PAD), jnp.float32)],
        ),
        compiler_params=pltpu.CompilerParams(
            dimension_semantics=("parallel", "arbitrary")),
    )(x, w1t, b1, w2, b2, w3, b3)
    return out[:b]


def init_params(key):
    """PyTorch-Linear style U(-1/sqrt(fan_in), +1/sqrt(fan_in)) init, stored in
    the kernel layout: W1 transposed, zero-padded, bf16; H1 padded to 128."""
    ks = jax.random.split(key, 6)

    def lin(kw, kb, fan_in, fan_out):
        lim = 1.0 / jnp.sqrt(jnp.float32(fan_in))
        w = jax.random.uniform(kw, (fan_out, fan_in), jnp.float32, -lim, lim)
        b = jax.random.uniform(kb, (1, fan_out), jnp.float32, -lim, lim)
        return w, b

    w1, b1 = lin(ks[0], ks[1], D_IN, H1)   # (H1, D_IN)  == PyTorch layout
    w2, b2 = lin(ks[2], ks[3], H1, H2)     # (H2, H1)
    w3, b3 = lin(ks[4], ks[5], H2, C)      # (C, H2)

    w1t = jnp.zeros((H1_PAD, D_PAD), jnp.float32).at[:H1, :D_IN].set(w1)
    w1t = w1t.astype(jnp.bfloat16)                     # dominant HBM tensor
    b1p = jnp.zeros((1, H1_PAD), jnp.float32).at[:, :H1].set(b1)
    w2p = jnp.zeros((H1_PAD, H2), jnp.float32).at[:H1, :].set(w2.T)
    return (w1t, b1p, w2p, b2, w3.T, b3)


def reference_forward(x, params):
    # Pure-JAX reference using the exact same (bf16-rounded) W1 values.
    w1t, b1, w2, b2, w3, b3 = params
    hi = jax.lax.Precision.HIGHEST
    w1 = w1t.astype(jnp.float32)[:H1, :D_IN]           # (H1, D_IN)
    h1 = _leaky_relu(jnp.dot(x, w1.T, precision=hi) + b1[:, :H1])
    h2 = _leaky_relu(jnp.dot(h1, w2[:H1], precision=hi) + b2)
    return _sigmoid(jnp.dot(h2, w3, precision=hi) + b3)


if __name__ == "__main__":
    key = jax.random.PRNGKey(0)
    kx, kp = jax.random.split(key)
    B = 256
    x = jax.random.normal(kx, (B, D_IN), jnp.float32)
    params = init_params(kp)

    out = jax.block_until_ready(classifier_forward(x, params))
    ref = reference_forward(x, params)

    assert out.shape == (B, C)
    assert bool(jnp.allclose(out, ref, atol=1e-3, rtol=1e-3)), "mismatch vs reference"
    print("KERNEL_OK")
</pallas_src>

<mosaic_0001>
module attributes {stable_mosaic.version = 11 : i64} {
  func.func @mlp_kernel(%arg0: i32, %arg1: i32, %arg2: memref<128x512xf32, #tpu.memory_space<vmem>>, %arg3: memref<128x512xbf16, #tpu.memory_space<vmem>>, %arg4: memref<1x128xf32, #tpu.memory_space<vmem>>, %arg5: memref<128x16xf32, #tpu.memory_space<vmem>>, %arg6: memref<1x16xf32, #tpu.memory_space<vmem>>, %arg7: memref<16x9xf32, #tpu.memory_space<vmem>>, %arg8: memref<1x9xf32, #tpu.memory_space<vmem>>, %arg9: memref<128x9xf32, #tpu.memory_space<vmem>>, %arg10: memref<128x128xf32, #tpu.memory_space<vmem>>) attributes {dimension_semantics = [#tpu.dimension_semantics<parallel>, #tpu.dimension_semantics<arbitrary>], iteration_bounds = array<i64: 2, 2>, scalar_prefetch = 0 : i64, scratch_operands = 1 : i64, tpu.core_type = #tpu.core_type<tc>, window_params = [{transform_indices = @transform_0, window_bounds = array<i64: 128, 512>}, {transform_indices = @transform_1, window_bounds = array<i64: 128, 512>}, {pipeline_mode = #tpu.pipeline_mode<synchronous>, transform_indices = @transform_2, window_bounds = array<i64: 1, 128>}, {pipeline_mode = #tpu.pipeline_mode<synchronous>, transform_indices = @transform_3, window_bounds = array<i64: 128, 16>}, {pipeline_mode = #tpu.pipeline_mode<synchronous>, transform_indices = @transform_4, window_bounds = array<i64: 1, 16>}, {pipeline_mode = #tpu.pipeline_mode<synchronous>, transform_indices = @transform_5, window_bounds = array<i64: 16, 9>}, {pipeline_mode = #tpu.pipeline_mode<synchronous>, transform_indices = @transform_6, window_bounds = array<i64: 1, 9>}, {transform_indices = @transform_7, window_bounds = array<i64: 128, 9>}]} {
    %c0_i32 = arith.constant 0 : i32
    %0 = arith.cmpi eq, %arg1, %c0_i32 : i32
    %1 = arith.extui %0 : i1 to i32
    %c0_i32_0 = arith.constant 0 : i32
    %2 = arith.cmpi ne, %1, %c0_i32_0 : i32
    scf.if %2 {
      %cst_9 = arith.constant 0.000000e+00 : f32
      %13 = vector.broadcast %cst_9 : f32 to vector<128x128xf32>
      %c0_10 = arith.constant 0 : index
      %c0_11 = arith.constant 0 : index
      %14 = vector.load %arg10[%c0_10, %c0_11] : memref<128x128xf32, #tpu.memory_space<vmem>>, vector<128x128xf32>
      tpu.vector_store %arg10[%c0_10, %c0_11], %13 {strides = array<i32>} : memref<128x128xf32, #tpu.memory_space<vmem>>, vector<128x128xf32>,
    } else {
    }
    %c0 = arith.constant 0 : index
    %c0_1 = arith.constant 0 : index
    %3 = vector.load %arg10[%c0, %c0_1] : memref<128x128xf32, #tpu.memory_space<vmem>>, vector<128x128xf32>
    %c0_2 = arith.constant 0 : index
    %c0_3 = arith.constant 0 : index
    %4 = vector.load %arg2[%c0_2, %c0_3] : memref<128x512xf32, #tpu.memory_space<vmem>>, vector<128x512xf32>
    %c0_4 = arith.constant 0 : index
    %c0_5 = arith.constant 0 : index
    %5 = vector.load %arg3[%c0_4, %c0_5] : memref<128x512xbf16, #tpu.memory_space<vmem>>, vector<128x512xbf16>
    %6 = arith.extf %5 : vector<128x512xbf16> to vector<128x512xf32>
    %cst = arith.constant dense<0.000000e+00> : vector<128x128xf32>
    %7 = tpu.matmul %4, %6, %cst {dimension_numbers = #tpu.dot_dimension_numbers<[1], [1], [0], [0], [0, 0, 1, 0], [], []>} : vector<128x512xf32>, vector<128x512xf32>, vector<128x128xf32> -> vector<128x128xf32>
    %8 = arith.addf %3, %7 : vector<128x128xf32>
    %c0_6 = arith.constant 0 : index
    %c0_7 = arith.constant 0 : index
    %9 = vector.load %arg10[%c0_6, %c0_7] : memref<128x128xf32, #tpu.memory_space<vmem>>, vector<128x128xf32>
    tpu.vector_store %arg10[%c0_6, %c0_7], %8 {strides = array<i32>} : memref<128x128xf32, #tpu.memory_space<vmem>>, vector<128x128xf32>,
    %c1_i32 = arith.constant 1 : i32
    %10 = arith.cmpi eq, %arg1, %c1_i32 : i32
    %11 = arith.extui %10 : i1 to i32
    %c0_i32_8 = arith.constant 0 : i32
    %12 = arith.cmpi ne, %11, %c0_i32_8 : i32
    scf.if %12 {
      %c0_9 = arith.constant 0 : index
      %c0_10 = arith.constant 0 : index
      %13 = vector.load %arg10[%c0_9, %c0_10] : memref<128x128xf32, #tpu.memory_space<vmem>>, vector<128x128xf32>
      %c0_11 = arith.constant 0 : index
      %c0_12 = arith.constant 0 : index
      %14 = vector.load %arg4[%c0_11, %c0_12] : memref<1x128xf32, #tpu.memory_space<vmem>>, vector<1x128xf32>
      %15 = vector.broadcast %14 : vector<1x128xf32> to vector<128x128xf32>
      %16 = arith.addf %13, %15 : vector<128x128xf32>
      %cst_13 = arith.constant 0.000000e+00 : f32
      %17 = vector.broadcast %cst_13 : f32 to vector<128x128xf32>
      %18 = arith.cmpf ogt, %16, %17 : vector<128x128xf32>
      %cst_14 = arith.constant 0.00999999977 : f32
      %19 = vector.broadcast %cst_14 : f32 to vector<128x128xf32>
      %20 = arith.mulf %19, %16 : vector<128x128xf32>
      %21 = arith.select %18, %16, %20 : vector<128x128xi1>, vector<128x128xf32>
      %c0_15 = arith.constant 0 : index
      %c0_16 = arith.constant 0 : index
      %22 = vector.load %arg5[%c0_15, %c0_16] : memref<128x16xf32, #tpu.memory_space<vmem>>, vector<128x16xf32>
      %cst_17 = arith.constant dense<0.000000e+00> : vector<128x16xf32>
      %23 = tpu.matmul %21, %22, %cst_17 {dimension_numbers = #tpu.dot_dimension_numbers<[1], [0], [0], [1], [0, 0, 1, 1], [], []>} : vector<128x128xf32>, vector<128x16xf32>, vector<128x16xf32> -> vector<128x16xf32>
      %c0_18 = arith.constant 0 : index
      %c0_19 = arith.constant 0 : index
      %24 = vector.load %arg6[%c0_18, %c0_19] : memref<1x16xf32, #tpu.memory_space<vmem>>, vector<1x16xf32>
      %25 = vector.broadcast %24 : vector<1x16xf32> to vector<128x16xf32>
      %26 = arith.addf %23, %25 : vector<128x16xf32>
      %cst_20 = arith.constant 0.000000e+00 : f32
      %27 = vector.broadcast %cst_20 : f32 to vector<128x16xf32>
      %28 = arith.cmpf ogt, %26, %27 : vector<128x16xf32>
      %cst_21 = arith.constant 0.00999999977 : f32
      %29 = vector.broadcast %cst_21 : f32 to vector<128x16xf32>
      %30 = arith.mulf %29, %26 : vector<128x16xf32>
      %31 = arith.select %28, %26, %30 : vector<128x16xi1>, vector<128x16xf32>
      %c0_22 = arith.constant 0 : index
      %c0_23 = arith.constant 0 : index
      %32 = vector.load %arg7[%c0_22, %c0_23] : memref<16x9xf32, #tpu.memory_space<vmem>>, vector<16x9xf32>
      %cst_24 = arith.constant dense<0.000000e+00> : vector<128x9xf32>
      %33 = tpu.matmul %31, %32, %cst_24 {dimension_numbers = #tpu.dot_dimension_numbers<[1], [0], [0], [1], [0, 0, 1, 1], [], []>} : vector<128x16xf32>, vector<16x9xf32>, vector<128x9xf32> -> vector<128x9xf32>
      %c0_25 = arith.constant 0 : index
      %c0_26 = arith.constant 0 : index
      %34 = vector.load %arg8[%c0_25, %c0_26] : memref<1x9xf32, #tpu.memory_space<vmem>>, vector<1x9xf32>
      %35 = vector.broadcast %34 : vector<1x9xf32> to vector<128x9xf32>
      %36 = arith.addf %33, %35 : vector<128x9xf32>
      %37 = math.absf %36 : vector<128x9xf32>
      %cst_27 = arith.constant 0.000000e+00 : f32
      %38 = vector.broadcast %cst_27 : f32 to vector<128x9xf32>
      %39 = arith.subf %38, %37 : vector<128x9xf32>
      %40 = math.exp %39 : vector<128x9xf32>
      %cst_28 = arith.constant 0.000000e+00 : f32
      %41 = vector.broadcast %cst_28 : f32 to vector<128x9xf32>
      %42 = arith.cmpf oge, %36, %41 : vector<128x9xf32>
      %cst_29 = arith.constant 1.000000e+00 : f32
      %43 = vector.broadcast %cst_29 : f32 to vector<128x9xf32>
      %44 = arith.addf %43, %40 : vector<128x9xf32>
      %cst_30 = arith.constant 1.000000e+00 : f32
      %45 = vector.broadcast %cst_30 : f32 to vector<128x9xf32>
      %46 = arith.divf %45, %44 : vector<128x9xf32>
      %cst_31 = arith.constant 1.000000e+00 : f32
      %47 = vector.broadcast %cst_31 : f32 to vector<128x9xf32>
      %48 = arith.addf %47, %40 : vector<128x9xf32>
      %49 = arith.divf %40, %48 : vector<128x9xf32>
      %50 = arith.select %42, %46, %49 : vector<128x9xi1>, vector<128x9xf32>
      %c0_32 = arith.constant 0 : index
      %c0_33 = arith.constant 0 : index
      %51 = vector.load %arg9[%c0_32, %c0_33] : memref<128x9xf32, #tpu.memory_space<vmem>>, vector<128x9xf32>
      tpu.vector_store %arg9[%c0_32, %c0_33], %50 {strides = array<i32>} : memref<128x9xf32, #tpu.memory_space<vmem>>, vector<128x9xf32>,
    } else {
    }
    return
  }
  func.func @transform_0(%arg0: i32, %arg1: i32) -> (i32, i32) {
    %c0_i32 = arith.constant 0 : i32
    return %arg0, %arg1 : i32, i32
  }
  func.func @transform_1(%arg0: i32, %arg1: i32) -> (i32, i32) {
    %c0_i32 = arith.constant 0 : i32
    %c0_i32_0 = arith.constant 0 : i32
    return %c0_i32, %arg1 : i32, i32
  }
  func.func @transform_2(%arg0: i32, %arg1: i32) -> (i32, i32) {
    %c0_i32 = arith.constant 0 : i32
    %c0_i32_0 = arith.constant 0 : i32
    %c0_i32_1 = arith.constant 0 : i32
    return %c0_i32, %c0_i32_0 : i32, i32
  }
  func.func @transform_3(%arg0: i32, %arg1: i32) -> (i32, i32) {
    %c0_i32 = arith.constant 0 : i32
    %c0_i32_0 = arith.constant 0 : i32
    %c0_i32_1 = arith.constant 0 : i32
    return %c0_i32, %c0_i32_0 : i32, i32
  }
  func.func @transform_4(%arg0: i32, %arg1: i32) -> (i32, i32) {
    %c0_i32 = arith.constant 0 : i32
    %c0_i32_0 = arith.constant 0 : i32
    %c0_i32_1 = arith.constant 0 : i32
    return %c0_i32, %c0_i32_0 : i32, i32
  }
  func.func @transform_5(%arg0: i32, %arg1: i32) -> (i32, i32) {
    %c0_i32 = arith.constant 0 : i32
    %c0_i32_0 = arith.constant 0 : i32
    %c0_i32_1 = arith.constant 0 : i32
    return %c0_i32, %c0_i32_0 : i32, i32
  }
  func.func @transform_6(%arg0: i32, %arg1: i32) -> (i32, i32) {
    %c0_i32 = arith.constant 0 : i32
    %c0_i32_0 = arith.constant 0 : i32
    %c0_i32_1 = arith.constant 0 : i32
    return %c0_i32, %c0_i32_0 : i32, i32
  }
  func.func @transform_7(%arg0: i32, %arg1: i32) -> (i32, i32) {
    %c0_i32 = arith.constant 0 : i32
    %c0_i32_0 = arith.constant 0 : i32
    return %arg0, %c0_i32 : i32, i32
  }
}

</mosaic_0001>

<bundles_post_ra>
// kernel: classifier_forward.1
= control target key start
LH: loop header
LB: loop body
LE: loop exit
PB: predicated region body
PF: predicated region fallthrough
CT: control target
= control target key end

     0   :  { %s2454_s24 = smov 0   ;;  %s2456_s25 = smov 0   ;;  %s3135_s0 = inlined_call_operand.vmem [shape: f32[256,1024], index: 0, kind: input, shape index: {}]   ;;  %s3136_s1 = inlined_call_operand.vmem [shape: bf16[128,1024], index: 1, kind: input, shape index: {}]   ;;  %s3137_s2 = inlined_call_operand.vmem [shape: f32[1,128], index: 2, kind: input, shape index: {}]   ;;  %s3138_s3 = inlined_call_operand.vmem [shape: f32[128,16], index: 3, kind: input, shape index: {}]   ;;  %s3139_s4 = inlined_call_operand.vmem [shape: f32[1,16], index: 4, kind: input, shape index: {}]   ;;  %s3140_s5 = inlined_call_operand.vmem [shape: f32[16,9], index: 5, kind: input, shape index: {}]   ;;  %s3141_s6 = inlined_call_operand.vmem [shape: f32[1,9], index: 6, kind: input, shape index: {}]   ;;  %s3142_s7 = inlined_call_operand.vmem [shape: f32[256,9], index: 7, kind: output, shape index: {}]  }
   0x1   :  { %s2458_s26 = smov 0   ;;  %s2460_s27 = smov 0  }
   0x2   :  { %s2462_s28 = smov 0   ;;  %s2464_s29 = smov 0  }
   0x3   :  { %s2466_s30 = smov 0   ;;  %s2468_s8 = smov 0  }
   0x4   :  { %s2470_s9 = smov 0  }
   0x5 LB: > { %s26_s10 = sadd.s32 1, %s2403_s30  ;;  %s29_s11 = sadd.s32 1, %s2407_s8  ;;  %s2411_s9 = sphi %s2470_s9, %s17_s9   ;;  %s2407_s8 = sphi %s2468_s8, %s3158_s8   ;;  %s2403_s30 = sphi %s2466_s30, %s3157_s30   ;;  %s2399_s29 = sphi %s2464_s29, %s3156_s29   ;;  %s2395_s28 = sphi %s2462_s28, %s3155_s28   ;;  %s2391_s27 = sphi %s2460_s27, %s3154_s27   ;;  %s2387_s26 = sphi %s2458_s26, %s3153_s26   ;;  %s2383_s25 = sphi %s2456_s25, %s3152_s25   ;;  %s2379_s24 = sphi %s2454_s24, %s3151_s24  }
   0x6   : > { %p27_p0 = scmp.ge.s32.totalorder %s26_s10, 2  ;;  %p45_p1 = scmp.ne.s32.totalorder %s2391_s27, %s2387_s26 }
   0x7   : > { %p46_p2 = scmp.eq.s32.totalorder %s2411_s9, 0  ;;  %s64_s14 = sadd.s32 1, %s2383_s25 }
   0x8   : > { %s3160_s10 = smov (%p27_p0, %s26_s10), 0  ;;  %s3162_s11 = smov (!%p27_p0, %s29_s11), %s2407_s8 }
   0x9   : > { %3145 = sst [smem:[#allocation5_spill]] %s3160_s10  ;;  %s34_s12 = ssub.s32 %s2403_s30, %s3160_s10 }
   0xa   : > { %p2509_p3 = por %p46_p2, %p45_p1  ;;  %p31_p4 = scmp.ge.s32.totalorder %s3162_s11, 2 }
   0xb   : > { %p62_p5 = scmp.eq.s32.totalorder %s34_s12, 0  ;;  %p71_p6 = scmp.ne.s32.totalorder %s2383_s25, %s2379_s24 }
   0xc   : > { %s3164_s11 = smov (%p31_p4, %s3162_s11), 0  ;;  %s38_s19 = sadd.s32 1, %s2391_s27 }
   0xd   : > { %3147 = sst [smem:[#allocation6_spill]] %s3164_s11  ;;  %s33_s16 = ssub.s32 %s2407_s8, %s3164_s11 }
   0xe   : > { %s2519_s15 = scalar_select %p62_p5, %s2383_s25, %s64_s14  }
   0xf   : > { %p2523_p7 = por %p71_p6, %p46_p2  ;;  %s35_s18 = sor.u32 %s34_s12, %s33_s16 }
  0x10   : > { %p36_p8 = scmp.eq.s32.totalorder %s35_s18, 0  ;;  %p1851_p9 = scmp.ge.s32.totalorder %s2411_s9, 4 }
  0x12   : > { %s2529_s20 = scalar_select %p36_p8, %s2391_s27, %s38_s19  }
  0x13   : > { %243 = sbr.rel (%p1851_p9) target bundleno = 85 (0x55), region = 36 }
  0x1a   : > { %246 = sbr.rel (!%p2509_p3) target bundleno = 65 (0x41), region = 40  ;;  %s248_s21 = sand.u32 (%p2509_p3), 1, %s2391_s27  }
  0x1b   : > { %s1854_s22 = sshll.u32 (%p2509_p3), %s2403_s30, 2  ;;  %s1852_s23 = sshll.u32 (%p2509_p3), %s248_s21, 9 }
  0x1c   : > { %s1888_s14 = sshll.u32 (%p2509_p3), %s2407_s8, 7  ;;  %s2545_s13 = scalar_lea.vmem (%p2509_p3), [#allocation3], %s1852_s23 }
  0x1d   : > { %s254_s11 = sadd.s32 (%p2509_p3), %s1888_s14, %s1854_s22 }
  0x1e   : > { %s1856_s10 = sshll.u32 (%p2509_p3), %s254_s11, 3 }
  0x1f   : > { %s2540_s18 = scalar_lea.vmem (%p2509_p3), %s3135_s0, %s1856_s10 }
  0x20   : > { %v269_v0 = vld [vmem:[%s2540_s18] sm:$0xff] (%p2509_p3)  ;;  %v271_v1 = vld [vmem:[%s2540_s18 + $0x8] sm:$0xff] (%p2509_p3)  ;;  %v273_v2 = vld [vmem:[%s2540_s18 + $0x10] sm:$0xff] (%p2509_p3) }
  0x21   : > { %270 = vst [vmem:[%s2545_s13] sm:$0xff] %v269_v0  ;;  %272 = vst [vmem:[%s2545_s13 + $0x8] sm:$0xff] %v271_v1  ;;  %v275_v3 = vld [vmem:[%s2540_s18 + $0x18] sm:$0xff]  ;;  %v277_v4 = vld [vmem:[%s2540_s18 + $0x40] sm:$0xff] }
  0x22   : > { %274 = vst [vmem:[%s2545_s13 + $0x10] sm:$0xff] %v273_v2  ;;  %v279_v5 = vld [vmem:[%s2540_s18 + $0x48] sm:$0xff]  ;;  %276 = vst [vmem:[%s2545_s13 + $0x18] sm:$0xff] %v275_v3  ;;  %v281_v6 = vld [vmem:[%s2540_s18 + $0x50] sm:$0xff] }
  0x23   : > { %278 = vst [vmem:[%s2545_s13 + $0x20] sm:$0xff] %v277_v4  ;;  %280 = vst [vmem:[%s2545_s13 + $0x28] sm:$0xff] %v279_v5  ;;  %v283_v7 = vld [vmem:[%s2540_s18 + $0x58] sm:$0xff]  ;;  %v285_v8 = vld [vmem:[%s2540_s18 + $0x80] sm:$0xff] }
  0x24   : > { %282 = vst [vmem:[%s2545_s13 + $0x30] sm:$0xff] %v281_v6  ;;  %284 = vst [vmem:[%s2545_s13 + $0x38] sm:$0xff] %v283_v7  ;;  %v287_v9 = vld [vmem:[%s2540_s18 + $0x88] sm:$0xff]  ;;  %v289_v10 = vld [vmem:[%s2540_s18 + $0x90] sm:$0xff] }
  0x25   : > { %286 = vst [vmem:[%s2545_s13 + $0x40] sm:$0xff] %v285_v8  ;;  %v291_v11 = vld [vmem:[%s2540_s18 + $0x98] sm:$0xff]  ;;  %288 = vst [vmem:[%s2545_s13 + $0x48] sm:$0xff] %v287_v9  ;;  %v293_v12 = vld [vmem:[%s2540_s18 + $0xc0] sm:$0xff] }
  0x26   : > { %290 = vst [vmem:[%s2545_s13 + $0x50] sm:$0xff] %v289_v10  ;;  %292 = vst [vmem:[%s2545_s13 + $0x58] sm:$0xff] %v291_v11  ;;  %v295_v13 = vld [vmem:[%s2540_s18 + $0xc8] sm:$0xff]  ;;  %v297_v14 = vld [vmem:[%s2540_s18 + $0xd0] sm:$0xff] }
  0x27   : > { %294 = vst [vmem:[%s2545_s13 + $0x60] sm:$0xff] %v293_v12  ;;  %296 = vst [vmem:[%s2545_s13 + $0x68] sm:$0xff] %v295_v13  ;;  %v299_v15 = vld [vmem:[%s2540_s18 + $0xd8] sm:$0xff]  ;;  %v301_v16 = vld [vmem:[%s2540_s18 + $0x100] sm:$0xff] }
  0x28   : > { %298 = vst [vmem:[%s2545_s13 + $0x70] sm:$0xff] %v297_v14  ;;  %v303_v17 = vld [vmem:[%s2540_s18 + $0x108] sm:$0xff]  ;;  %300 = vst [vmem:[%s2545_s13 + $0x78] sm:$0xff] %v299_v15  ;;  %v305_v18 = vld [vmem:[%s2540_s18 + $0x110] sm:$0xff] }
  0x29   : > { %302 = vst [vmem:[%s2545_s13 + $0x80] sm:$0xff] %v301_v16  ;;  %304 = vst [vmem:[%s2545_s13 + $0x88] sm:$0xff] %v303_v17  ;;  %v307_v19 = vld [vmem:[%s2540_s18 + $0x118] sm:$0xff]  ;;  %v309_v20 = vld [vmem:[%s2540_s18 + $0x140] sm:$0xff] }
  0x2a   : > { %306 = vst [vmem:[%s2545_s13 + $0x90] sm:$0xff] %v305_v18  ;;  %308 = vst [vmem:[%s2545_s13 + $0x98] sm:$0xff] %v307_v19  ;;  %v311_v21 = vld [vmem:[%s2540_s18 + $0x148] sm:$0xff]  ;;  %v313_v22 = vld [vmem:[%s2540_s18 + $0x150] sm:$0xff] }
  0x2b   : > { %310 = vst [vmem:[%s2545_s13 + $0xa0] sm:$0xff] %v309_v20  ;;  %v315_v23 = vld [vmem:[%s2540_s18 + $0x158] sm:$0xff]  ;;  %312 = vst [vmem:[%s2545_s13 + $0xa8] sm:$0xff] %v311_v21  ;;  %v317_v24 = vld [vmem:[%s2540_s18 + $0x180] sm:$0xff] }
  0x2c   : > { %314 = vst [vmem:[%s2545_s13 + $0xb0] sm:$0xff] %v313_v22  ;;  %316 = vst [vmem:[%s2545_s13 + $0xb8] sm:$0xff] %v315_v23  ;;  %v319_v25 = vld [vmem:[%s2540_s18 + $0x188] sm:$0xff]  ;;  %v321_v26 = vld [vmem:[%s2540_s18 + $0x190] sm:$0xff] }
  0x2d   : > { %318 = vst [vmem:[%s2545_s13 + $0xc0] sm:$0xff] %v317_v24  ;;  %320 = vst [vmem:[%s2545_s13 + $0xc8] sm:$0xff] %v319_v25  ;;  %v323_v27 = vld [vmem:[%s2540_s18 + $0x198] sm:$0xff]  ;;  %v325_v28 = vld [vmem:[%s2540_s18 + $0x1c0] sm:$0xff] }
  0x2e   : > { %322 = vst [vmem:[%s2545_s13 + $0xd0] sm:$0xff] %v321_v26  ;;  %v327_v29 = vld [vmem:[%s2540_s18 + $0x1c8] sm:$0xff]  ;;  %324 = vst [vmem:[%s2545_s13 + $0xd8] sm:$0xff] %v323_v27  ;;  %v329_v30 = vld [vmem:[%s2540_s18 + $0x1d0] sm:$0xff] }
  0x2f   : > { %326 = vst [vmem:[%s2545_s13 + $0xe0] sm:$0xff] %v325_v28  ;;  %328 = vst [vmem:[%s2545_s13 + $0xe8] sm:$0xff] %v327_v29  ;;  %v331_v31 = vld [vmem:[%s2540_s18 + $0x1d8] sm:$0xff]  ;;  %v333_v32 = vld [vmem:[%s2540_s18 + $0x200] sm:$0xff] }
  0x30   : > { %330 = vst [vmem:[%s2545_s13 + $0xf0] sm:$0xff] %v329_v30  ;;  %332 = vst [vmem:[%s2545_s13 + $0xf8] sm:$0xff] %v331_v31  ;;  %v335_v33 = vld [vmem:[%s2540_s18 + $0x208] sm:$0xff]  ;;  %v337_v34 = vld [vmem:[%s2540_s18 + $0x210] sm:$0xff] }
  0x31   : > { %334 = vst [vmem:[%s2545_s13 + $0x100] sm:$0xff] %v333_v32  ;;  %v339_v35 = vld [vmem:[%s2540_s18 + $0x218] sm:$0xff]  ;;  %336 = vst [vmem:[%s2545_s13 + $0x108] sm:$0xff] %v335_v33  ;;  %v341_v36 = vld [vmem:[%s2540_s18 + $0x240] sm:$0xff] }
  0x32   : > { %338 = vst [vmem:[%s2545_s13 + $0x110] sm:$0xff] %v337_v34  ;;  %340 = vst [vmem:[%s2545_s13 + $0x118] sm:$0xff] %v339_v35  ;;  %v343_v37 = vld [vmem:[%s2540_s18 + $0x248] sm:$0xff]  ;;  %v345_v38 = vld [vmem:[%s2540_s18 + $0x250] sm:$0xff] }
  0x33   : > { %342 = vst [vmem:[%s2545_s13 + $0x120] sm:$0xff] %v341_v36  ;;  %344 = vst [vmem:[%s2545_s13 + $0x128] sm:$0xff] %v343_v37  ;;  %v347_v39 = vld [vmem:[%s2540_s18 + $0x258] sm:$0xff]  ;;  %v349_v40 = vld [vmem:[%s2540_s18 + $0x280] sm:$0xff] }
  0x34   : > { %346 = vst [vmem:[%s2545_s13 + $0x130] sm:$0xff] %v345_v38  ;;  %v351_v41 = vld [vmem:[%s2540_s18 + $0x288] sm:$0xff]  ;;  %348 = vst [vmem:[%s2545_s13 + $0x138] sm:$0xff] %v347_v39  ;;  %v353_v42 = vld [vmem:[%s2540_s18 + $0x290] sm:$0xff] }
  0x35   : > { %350 = vst [vmem:[%s2545_s13 + $0x140] sm:$0xff] %v349_v40  ;;  %352 = vst [vmem:[%s2545_s13 + $0x148] sm:$0xff] %v351_v41  ;;  %v355_v43 = vld [vmem:[%s2540_s18 + $0x298] sm:$0xff]  ;;  %v357_v44 = vld [vmem:[%s2540_s18 + $0x2c0] sm:$0xff] }
  0x36   : > { %354 = vst [vmem:[%s2545_s13 + $0x150] sm:$0xff] %v353_v42  ;;  %356 = vst [vmem:[%s2545_s13 + $0x158] sm:$0xff] %v355_v43  ;;  %v359_v45 = vld [vmem:[%s2540_s18 + $0x2c8] sm:$0xff]  ;;  %v361_v46 = vld [vmem:[%s2540_s18 + $0x2d0] sm:$0xff] }
  0x37   : > { %358 = vst [vmem:[%s2545_s13 + $0x160] sm:$0xff] %v357_v44  ;;  %v363_v47 = vld [vmem:[%s2540_s18 + $0x2d8] sm:$0xff]  ;;  %360 = vst [vmem:[%s2545_s13 + $0x168] sm:$0xff] %v359_v45  ;;  %v365_v48 = vld [vmem:[%s2540_s18 + $0x300] sm:$0xff] }
  0x38   : > { %362 = vst [vmem:[%s2545_s13 + $0x170] sm:$0xff] %v361_v46  ;;  %364 = vst [vmem:[%s2545_s13 + $0x178] sm:$0xff] %v363_v47  ;;  %v367_v49 = vld [vmem:[%s2540_s18 + $0x308] sm:$0xff]  ;;  %v369_v50 = vld [vmem:[%s2540_s18 + $0x310] sm:$0xff] }
  0x39   : > { %366 = vst [vmem:[%s2545_s13 + $0x180] sm:$0xff] %v365_v48  ;;  %368 = vst [vmem:[%s2545_s13 + $0x188] sm:$0xff] %v367_v49  ;;  %v371_v51 = vld [vmem:[%s2540_s18 + $0x318] sm:$0xff]  ;;  %v373_v52 = vld [vmem:[%s2540_s18 + $0x340] sm:$0xff] }
  0x3a   : > { %370 = vst [vmem:[%s2545_s13 + $0x190] sm:$0xff] %v369_v50  ;;  %v375_v53 = vld [vmem:[%s2540_s18 + $0x348] sm:$0xff]  ;;  %372 = vst [vmem:[%s2545_s13 + $0x198] sm:$0xff] %v371_v51  ;;  %v377_v54 = vld [vmem:[%s2540_s18 + $0x350] sm:$0xff] }
  0x3b   : > { %374 = vst [vmem:[%s2545_s13 + $0x1a0] sm:$0xff] %v373_v52  ;;  %376 = vst [vmem:[%s2545_s13 + $0x1a8] sm:$0xff] %v375_v53  ;;  %v379_v55 = vld [vmem:[%s2540_s18 + $0x358] sm:$0xff]  ;;  %v381_v56 = vld [vmem:[%s2540_s18 + $0x380] sm:$0xff] }
  0x3c   : > { %378 = vst [vmem:[%s2545_s13 + $0x1b0] sm:$0xff] %v377_v54  ;;  %380 = vst [vmem:[%s2545_s13 + $0x1b8] sm:$0xff] %v379_v55  ;;  %v383_v57 = vld [vmem:[%s2540_s18 + $0x388] sm:$0xff]  ;;  %v385_v58 = vld [vmem:[%s2540_s18 + $0x390] sm:$0xff] }
  0x3d   : > { %382 = vst [vmem:[%s2545_s13 + $0x1c0] sm:$0xff] %v381_v56  ;;  %v387_v59 = vld [vmem:[%s2540_s18 + $0x398] sm:$0xff]  ;;  %384 = vst [vmem:[%s2545_s13 + $0x1c8] sm:$0xff] %v383_v57  ;;  %v389_v60 = vld [vmem:[%s2540_s18 + $0x3c0] sm:$0xff] }
  0x3e   : > { %386 = vst [vmem:[%s2545_s13 + $0x1d0] sm:$0xff] %v385_v58  ;;  %388 = vst [vmem:[%s2545_s13 + $0x1d8] sm:$0xff] %v387_v59  ;;  %v391_v61 = vld [vmem:[%s2540_s18 + $0x3c8] sm:$0xff]  ;;  %v393_v62 = vld [vmem:[%s2540_s18 + $0x3d0] sm:$0xff] }
  0x3f   : > { %390 = vst [vmem:[%s2545_s13 + $0x1e0] sm:$0xff] %v389_v60  ;;  %392 = vst [vmem:[%s2545_s13 + $0x1e8] sm:$0xff] %v391_v61  ;;  %v395_v63 = vld [vmem:[%s2540_s18 + $0x3d8] sm:$0xff] }
  0x40   : > { %394 = vst [vmem:[%s2545_s13 + $0x1f0] sm:$0xff] %v393_v62  ;;  %396 = vst [vmem:[%s2545_s13 + $0x1f8] sm:$0xff] %v395_v63 }
  0x41 PF: > { %402 = sbr.rel (!%p2523_p7) target bundleno = 85 (0x55), region = 63  ;;  %s404_s10 = sand.u32 (%p2523_p7), 1, %s2383_s25  }
  0x42   : > { %s1889_s11 = sshll.u32 (%p2523_p7), %s2403_s30, 4  ;;  %s1857_s19 = sshll.u32 (%p2523_p7), %s404_s10, 8 }
  0x43   : > { %s2679_s23 = scalar_lea.vmem (%p2523_p7), %s3136_s1, %s1889_s11  ;;  %s2684_s17 = scalar_lea.vmem (%p2523_p7), [#allocation4], %s1857_s19 }
  0x44   : > { %v422_v0 = vld [vmem:[%s2679_s23] sm:$0xff] (%p2523_p7)  ;;  %v424_v1 = vld [vmem:[%s2679_s23 + $0x8] sm:$0xff] (%p2523_p7) }
  0x45   : > { %v426_v2 = vld [vmem:[%s2679_s23 + $0x20] sm:$0xff] (%p2523_p7)  ;;  %423 = vst [vmem:[%s2684_s17] sm:$0xff] (%p2523_p7), %v422_v0  ;;  %425 = vst [vmem:[%s2684_s17 + $0x8] sm:$0xff] (%p2523_p7), %v424_v1  ;;  %v428_v3 = vld [vmem:[%s2679_s23 + $0x28] sm:$0xff] (%p2523_p7) }
  0x46   : > { %427 = vst [vmem:[%s2684_s17 + $0x10] sm:$0xff] (%p2523_p7), %v426_v2  ;;  %v430_v4 = vld [vmem:[%s2679_s23 + $0x40] sm:$0xff] (%p2523_p7)  ;;  %v432_v5 = vld [vmem:[%s2679_s23 + $0x48] sm:$0xff] (%p2523_p7)  ;;  %429 = vst [vmem:[%s2684_s17 + $0x18] sm:$0xff] (%p2523_p7), %v428_v3 }
  0x47   : > { %431 = vst [vmem:[%s2684_s17 + $0x20] sm:$0xff] (%p2523_p7), %v430_v4  ;;  %433 = vst [vmem:[%s2684_s17 + $0x28] sm:$0xff] (%p2523_p7), %v432_v5  ;;  %v434_v6 = vld [vmem:[%s2679_s23 + $0x60] sm:$0xff] (%p2523_p7)  ;;  %v436_v7 = vld [vmem:[%s2679_s23 + $0x68] sm:$0xff] (%p2523_p7) }
  0x48   : > { %v438_v8 = vld [vmem:[%s2679_s23 + $0x80] sm:$0xff]  ;;  %435 = vst [vmem:[%s2684_s17 + $0x30] sm:$0xff] %v434_v6  ;;  %437 = vst [vmem:[%s2684_s17 + $0x38] sm:$0xff] %v436_v7  ;;  %v440_v9 = vld [vmem:[%s2679_s23 + $0x88] sm:$0xff] }
  0x49   : > { %439 = vst [vmem:[%s2684_s17 + $0x40] sm:$0xff] %v438_v8  ;;  %v442_v10 = vld [vmem:[%s2679_s23 + $0xa0] sm:$0xff]  ;;  %v444_v11 = vld [vmem:[%s2679_s23 + $0xa8] sm:$0xff]  ;;  %441 = vst [vmem:[%s2684_s17 + $0x48] sm:$0xff] %v440_v9 }
  0x4a   : > { %443 = vst [vmem:[%s2684_s17 + $0x50] sm:$0xff] %v442_v10  ;;  %445 = vst [vmem:[%s2684_s17 + $0x58] sm:$0xff] %v444_v11  ;;  %v446_v12 = vld [vmem:[%s2679_s23 + $0xc0] sm:$0xff]  ;;  %v448_v13 = vld [vmem:[%s2679_s23 + $0xc8] sm:$0xff] }
  0x4b   : > { %v450_v14 = vld [vmem:[%s2679_s23 + $0xe0] sm:$0xff]  ;;  %447 = vst [vmem:[%s2684_s17 + $0x60] sm:$0xff] %v446_v12  ;;  %449 = vst [vmem:[%s2684_s17 + $0x68] sm:$0xff] %v448_v13  ;;  %v452_v15 = vld [vmem:[%s2679_s23 + $0xe8] sm:$0xff] }
  0x4c   : > { %451 = vst [vmem:[%s2684_s17 + $0x70] sm:$0xff] %v450_v14  ;;  %v454_v16 = vld [vmem:[%s2679_s23 + $0x100] sm:$0xff]  ;;  %v456_v17 = vld [vmem:[%s2679_s23 + $0x108] sm:$0xff]  ;;  %453 = vst [vmem:[%s2684_s17 + $0x78] sm:$0xff] %v452_v15 }
  0x4d   : > { %455 = vst [vmem:[%s2684_s17 + $0x80] sm:$0xff] %v454_v16  ;;  %457 = vst [vmem:[%s2684_s17 + $0x88] sm:$0xff] %v456_v17  ;;  %v458_v18 = vld [vmem:[%s2679_s23 + $0x120] sm:$0xff]  ;;  %v460_v19 = vld [vmem:[%s2679_s23 + $0x128] sm:$0xff] }
  0x4e   : > { %v462_v20 = vld [vmem:[%s2679_s23 + $0x140] sm:$0xff]  ;;  %459 = vst [vmem:[%s2684_s17 + $0x90] sm:$0xff] %v458_v18  ;;  %461 = vst [vmem:[%s2684_s17 + $0x98] sm:$0xff] %v460_v19  ;;  %v464_v21 = vld [vmem:[%s2679_s23 + $0x148] sm:$0xff] }
  0x4f   : > { %463 = vst [vmem:[%s2684_s17 + $0xa0] sm:$0xff] %v462_v20  ;;  %v466_v22 = vld [vmem:[%s2679_s23 + $0x160] sm:$0xff]  ;;  %v468_v23 = vld [vmem:[%s2679_s23 + $0x168] sm:$0xff]  ;;  %465 = vst [vmem:[%s2684_s17 + $0xa8] sm:$0xff] %v464_v21 }
  0x50   : > { %467 = vst [vmem:[%s2684_s17 + $0xb0] sm:$0xff] %v466_v22  ;;  %469 = vst [vmem:[%s2684_s17 + $0xb8] sm:$0xff] %v468_v23  ;;  %v470_v24 = vld [vmem:[%s2679_s23 + $0x180] sm:$0xff]  ;;  %v472_v25 = vld [vmem:[%s2679_s23 + $0x188] sm:$0xff] }
  0x51   : > { %v474_v26 = vld [vmem:[%s2679_s23 + $0x1a0] sm:$0xff]  ;;  %471 = vst [vmem:[%s2684_s17 + $0xc0] sm:$0xff] %v470_v24  ;;  %473 = vst [vmem:[%s2684_s17 + $0xc8] sm:$0xff] %v472_v25  ;;  %v476_v27 = vld [vmem:[%s2679_s23 + $0x1a8] sm:$0xff] }
  0x52   : > { %475 = vst [vmem:[%s2684_s17 + $0xd0] sm:$0xff] %v474_v26  ;;  %v478_v28 = vld [vmem:[%s2679_s23 + $0x1c0] sm:$0xff]  ;;  %v480_v29 = vld [vmem:[%s2679_s23 + $0x1c8] sm:$0xff]  ;;  %477 = vst [vmem:[%s2684_s17 + $0xd8] sm:$0xff] %v476_v27 }
  0x53   : > { %479 = vst [vmem:[%s2684_s17 + $0xe0] sm:$0xff] %v478_v28  ;;  %481 = vst [vmem:[%s2684_s17 + $0xe8] sm:$0xff] %v480_v29  ;;  %v482_v30 = vld [vmem:[%s2679_s23 + $0x1e0] sm:$0xff]  ;;  %v484_v31 = vld [vmem:[%s2679_s23 + $0x1e8] sm:$0xff] }
  0x54   : > { %483 = vst [vmem:[%s2684_s17 + $0xf0] sm:$0xff] %v482_v30  ;;  %485 = vst [vmem:[%s2684_s17 + $0xf8] sm:$0xff] %v484_v31 }
  0x55 PF: > { %p1860_p10 = scmp.ge.s32.totalorder %s2411_s9, 1  ;;  %p490_p11 = scmp.lt.s32.totalorder %s2411_s9, 5 }
  0x57   : > { %p491_p12 = pnand %p1860_p10, %p490_p11 }
  0x58   : > { %s497_s14 = sand.u32 (!%p491_p12), 1, %s2387_s26   ;;  %s504_s12 = sand.u32 (!%p491_p12), 1, %s2379_s24  }
  0x59   : > { %494 = sbr.rel (%p491_p12) target bundleno = 946 (0x3b2), region = 86  ;;  %s1861_s16 = sshll.u32 (!%p491_p12), %s497_s14, 9 }
  0x5a   : > { %s1862_s18 = sshll.u32 (!%p491_p12), %s504_s12, 8  ;;  %s1863_s13 = sshll.u32 (!%p491_p12), %s2399_s29, 4 }
  0x5b   : > { %p543_p13 = scmp.lt.s32.totalorder (!%p491_p12), %s1863_s13, 31  ;;  %s2757_s22 = scalar_lea.vmem (!%p491_p12), [#allocation3], %s1861_s16 }
  0x5c   : > { %s2759_s23 = scalar_lea.vmem (!%p491_p12), [#allocation4], %s1862_s18  ;;  %p1865_p0 = scmp.ne.s32.totalorder (!%p491_p12), %s2395_s28, 0 }
  0x60   : > { %s3166_s13 = smov (!%p543_p13, %s1863_s13), 31  ;;  %551 = sbr.rel (%p1865_p0) target bundleno = 106 (0x6a), region = 98 }
  0x61   : > { %s1864_s10 = sshll.u32 %s3166_s13, 3  ;;  %v2413_v32 = vmov (!%p1865_p0), 0.0  }
  0x62   : > { %s2755_s21 = scalar_lea.vmem %s3142_s7, %s1864_s10  ;;  %552 = vst [vmem:[#allocation2] sm:$0xff] (!%p1865_p0), %v2413_v32  ;;  %553 = vst [vmem:[#allocation2 + $0x8] sm:$0xff] (!%p1865_p0), %v2413_v32 }
  0x63   : > { %554 = vst [vmem:[#allocation2 + $0x10] sm:$0xff] (!%p1865_p0), %v2413_v32  ;;  %555 = vst [vmem:[#allocation2 + $0x18] sm:$0xff] (!%p1865_p0), %v2413_v32 }
  0x64   : > { %556 = vst [vmem:[#allocation2 + $0x20] sm:$0xff] (!%p1865_p0), %v2413_v32  ;;  %557 = vst [vmem:[#allocation2 + $0x28] sm:$0xff] (!%p1865_p0), %v2413_v32 }
  0x65   : > { %558 = vst [vmem:[#allocation2 + $0x30] sm:$0xff] (!%p1865_p0), %v2413_v32  ;;  %559 = vst [vmem:[#allocation2 + $0x38] sm:$0xff] (!%p1865_p0), %v2413_v32 }
  0x66   : > { %560 = vst [vmem:[#allocation2 + $0x40] sm:$0xff] (!%p1865_p0), %v2413_v32  ;;  %561 = vst [vmem:[#allocation2 + $0x48] sm:$0xff] (!%p1865_p0), %v2413_v32 }
  0x67   : > { %562 = vst [vmem:[#allocation2 + $0x50] sm:$0xff] %v2413_v32  ;;  %563 = vst [vmem:[#allocation2 + $0x58] sm:$0xff] %v2413_v32 }
  0x68   : > { %564 = vst [vmem:[#allocation2 + $0x60] sm:$0xff] %v2413_v32  ;;  %565 = vst [vmem:[#allocation2 + $0x68] sm:$0xff] %v2413_v32 }
  0x69   : > { %566 = vst [vmem:[#allocation2 + $0x70] sm:$0xff] %v2413_v32  ;;  %567 = vst [vmem:[#allocation2 + $0x78] sm:$0xff] %v2413_v32 }
  0x6a PF: > { %v2229_v33 = vld [vmem:[%s2759_s23 + $0x4] ss:$16 sps:$4 sm:$0xff]   ;;  %v2231_v34 = vld [vmem:[%s2759_s23 + $0xc] ss:$16 sps:$4 sm:$0xff]   ;;  %v2233_v35 = vld [vmem:[%s2759_s23] ss:$16 sps:$4 sm:$0xff]  }
  0x6b   : > { %2025 = vmatprep.subr.bf16.mxu0 %v2229_v33  ;;  %v2234_v36 = vld [vmem:[%s2759_s23 + $0x8] ss:$16 sps:$4 sm:$0xff]   ;;  %2057 = vmatprep.subr.bf16.mxu1 %v2231_v34  ;;  %v2235_v37 = vld [vmem:[%s2759_s23 + $0x24] ss:$16 sps:$4 sm:$0xff]   ;;  %v2237_v38 = vld [vmem:[%s2759_s23 + $0x2c] ss:$16 sps:$4 sm:$0xff]  }
  0x6c   : > { %2027 = vmatpush1.bf16.xpose.msra.mxu0 %v2233_v35  ;;  %2059 = vmatpush1.bf16.xpose.msra.mxu1 %v2234_v36  ;;  %v2239_v39 = vld [vmem:[%s2759_s23 + $0x20] ss:$16 sps:$4 sm:$0xff]   ;;  %v2240_v40 = vld [vmem:[%s2759_s23 + $0x28] ss:$16 sps:$4 sm:$0xff]   ;;  %v2241_v41 = vld [vmem:[%s2759_s23 + $0x44] ss:$16 sps:$4 sm:$0xff]  }
  0x6d   : > { %2029 = vmatprep.subr.bf16.mxu0 %v2235_v37  ;;  %2061 = vmatprep.subr.bf16.mxu1 %v2237_v38  ;;  %v2243_v42 = vld [vmem:[%s2759_s23 + $0x4c] ss:$16 sps:$4 sm:$0xff]   ;;  %v2245_v43 = vld [vmem:[%s2759_s23 + $0x40] ss:$16 sps:$4 sm:$0xff]   ;;  %v2246_v44 = vld [vmem:[%s2759_s23 + $0x48] ss:$16 sps:$4 sm:$0xff]  }
  0x6e   : > { %v2247_v45 = vld [vmem:[%s2759_s23 + $0x64] ss:$16 sps:$4 sm:$0xff]   ;;  %v2249_v46 = vld [vmem:[%s2759_s23 + $0x6c] ss:$16 sps:$4 sm:$0xff]   ;;  %v2251_v49 = vld [vmem:[%s2759_s23 + $0x60] ss:$16 sps:$4 sm:$0xff]  }
  0x6f   : > { %v585_v47 = vld [vmem:[%s2757_s22 + $0x8] sm:$0xff]  ;;  %v587_v48 = vld [vmem:[%s2757_s22 + $0x18] sm:$0xff]  ;;  %v2253_v51 = vld [vmem:[%s2759_s23 + $0x84] ss:$16 sps:$4 sm:$0xff]   ;;  %p1866_p1 = scmp.ne.s32.totalorder %s2395_s28, 1 }
  0x70   : > { %808 = vmatprep.mubr.f32.mxu0 %v585_v47  ;;  %953 = vmatprep.mubr.f32.mxu1 %v587_v48  ;;  %v2252_v50 = vld [vmem:[%s2759_s23 + $0x68] ss:$16 sps:$4 sm:$0xff]   ;;  %v2255_v52 = vld [vmem:[%s2759_s23 + $0x8c] ss:$16 sps:$4 sm:$0xff]   ;;  %v2257_v53 = vld [vmem:[%s2759_s23 + $0x80] ss:$16 sps:$4 sm:$0xff]  }
  0x71   : > { %v2258_v54 = vld [vmem:[%s2759_s23 + $0x88] ss:$16 sps:$4 sm:$0xff]   ;;  %v2259_v55 = vld [vmem:[%s2759_s23 + $0xa4] ss:$16 sps:$4 sm:$0xff]   ;;  %v2261_v56 = vld [vmem:[%s2759_s23 + $0xac] ss:$16 sps:$4 sm:$0xff]  }
  0x72   : > { %v2263_v57 = vld [vmem:[%s2759_s23 + $0xa0] ss:$16 sps:$4 sm:$0xff]   ;;  %v2264_v58 = vld [vmem:[%s2759_s23 + $0xa8] ss:$16 sps:$4 sm:$0xff]   ;;  %v2265_v59 = vld [vmem:[%s2759_s23 + $0xc4] ss:$16 sps:$4 sm:$0xff]  }
  0x73   : > { %v2267_v60 = vld [vmem:[%s2759_s23 + $0xcc] ss:$16 sps:$4 sm:$0xff]   ;;  %v2269_v61 = vld [vmem:[%s2759_s23 + $0xc0] ss:$16 sps:$4 sm:$0xff]   ;;  %v2270_v62 = vld [vmem:[%s2759_s23 + $0xc8] ss:$16 sps:$4 sm:$0xff]  }
  0x74   : > { %2031 = vmatpush1.bf16.xpose.msra.mxu0 %v2239_v39  ;;  %2063 = vmatpush1.bf16.xpose.msra.mxu1 %v2240_v40  ;;  %v2271_v63 = vld [vmem:[%s2759_s23 + $0xe4] ss:$16 sps:$4 sm:$0xff]   ;;  %v2273_v0 = vld [vmem:[%s2759_s23 + $0xec] ss:$16 sps:$4 sm:$0xff]   ;;  %v2275_v1 = vld [vmem:[%s2759_s23 + $0xe0] ss:$16 sps:$4 sm:$0xff]  }
  0x75   : > { %2033 = vmatprep.subr.bf16.mxu0 %v2241_v41  ;;  %2065 = vmatprep.subr.bf16.mxu1 %v2243_v42  ;;  %v2276_v2 = vld [vmem:[%s2759_s23 + $0xe8] ss:$16 sps:$4 sm:$0xff]   ;;  %v584_v3 = vld [vmem:[%s2757_s22] sm:$0xff]  ;;  %v586_v4 = vld [vmem:[%s2757_s22 + $0x10] sm:$0xff] }
  0x76   : > { %v589_v5 = vld [vmem:[%s2757_s22 + $0x28] sm:$0xff]  ;;  %v591_v6 = vld [vmem:[%s2757_s22 + $0x38] sm:$0xff]  ;;  %v588_v7 = vld [vmem:[%s2757_s22 + $0x20] sm:$0xff] }
  0x77   : > { %v590_v8 = vld [vmem:[%s2757_s22 + $0x30] sm:$0xff]  ;;  %v593_v9 = vld [vmem:[%s2757_s22 + $0x48] sm:$0xff]  ;;  %v595_v10 = vld [vmem:[%s2757_s22 + $0x58] sm:$0xff] }
  0x78   : > { %v592_v11 = vld [vmem:[%s2757_s22 + $0x40] sm:$0xff]  ;;  %v594_v12 = vld [vmem:[%s2757_s22 + $0x50] sm:$0xff]  ;;  %v597_v13 = vld [vmem:[%s2757_s22 + $0x68] sm:$0xff] }
  0x79   : > { %v599_v14 = vld [vmem:[%s2757_s22 + $0x78] sm:$0xff]  ;;  %v596_v15 = vld [vmem:[%s2757_s22 + $0x60] sm:$0xff]  ;;  %v598_v16 = vld [vmem:[%s2757_s22 + $0x70] sm:$0xff] }
  0x7a   : > { %v601_v17 = vld [vmem:[%s2757_s22 + $0x88] sm:$0xff]  ;;  %v603_v18 = vld [vmem:[%s2757_s22 + $0x98] sm:$0xff]  ;;  %v600_v19 = vld [vmem:[%s2757_s22 + $0x80] sm:$0xff] }
  0x7b   : > { %v602_v20 = vld [vmem:[%s2757_s22 + $0x90] sm:$0xff]  ;;  %v605_v21 = vld [vmem:[%s2757_s22 + $0xa8] sm:$0xff]  ;;  %v607_v22 = vld [vmem:[%s2757_s22 + $0xb8] sm:$0xff] }
  0x7c   : > { %2035 = vmatpush1.bf16.xpose.msra.mxu0 %v2245_v43  ;;  %2067 = vmatpush1.bf16.xpose.msra.mxu1 %v2246_v44  ;;  %v604_v23 = vld [vmem:[%s2757_s22 + $0xa0] sm:$0xff]  ;;  %v606_v24 = vld [vmem:[%s2757_s22 + $0xb0] sm:$0xff]  ;;  %v609_v25 = vld [vmem:[%s2757_s22 + $0xc8] sm:$0xff] }
  0x7d   : > { %2037 = vmatprep.subr.bf16.mxu0 %v2247_v45  ;;  %2069 = vmatprep.subr.bf16.mxu1 %v2249_v46  ;;  %v611_v26 = vld [vmem:[%s2757_s22 + $0xd8] sm:$0xff]  ;;  %v608_v27 = vld [vmem:[%s2757_s22 + $0xc0] sm:$0xff]  ;;  %v610_v28 = vld [vmem:[%s2757_s22 + $0xd0] sm:$0xff] }
  0x7e   : > { %v613_v29 = vld [vmem:[%s2757_s22 + $0xe8] sm:$0xff]  ;;  %v615_v30 = vld [vmem:[%s2757_s22 + $0xf8] sm:$0xff]  ;;  %v612_v31 = vld [vmem:[%s2757_s22 + $0xe0] sm:$0xff] }
  0x7f   : > { %v614_v32 = vld [vmem:[%s2757_s22 + $0xf0] sm:$0xff]  ;;  %v617_v33 = vld [vmem:[%s2757_s22 + $0x108] sm:$0xff]  ;;  %v619_v34 = vld [vmem:[%s2757_s22 + $0x118] sm:$0xff] }
  0x80   : > { %v616_v35 = vld [vmem:[%s2757_s22 + $0x100] sm:$0xff]  ;;  %v618_v36 = vld [vmem:[%s2757_s22 + $0x110] sm:$0xff]  ;;  %v621_v37 = vld [vmem:[%s2757_s22 + $0x128] sm:$0xff] }
  0x81   : > { %v623_v38 = vld [vmem:[%s2757_s22 + $0x138] sm:$0xff]  ;;  %v620_v39 = vld [vmem:[%s2757_s22 + $0x120] sm:$0xff]  ;;  %v622_v40 = vld [vmem:[%s2757_s22 + $0x130] sm:$0xff] }
  0x82   : > { %v625_v41 = vld [vmem:[%s2757_s22 + $0x148] sm:$0xff]  ;;  %v627_v42 = vld [vmem:[%s2757_s22 + $0x158] sm:$0xff]  ;;  %v624_v43 = vld [vmem:[%s2757_s22 + $0x140] sm:$0xff] }
  0x83   : > { %v626_v44 = vld [vmem:[%s2757_s22 + $0x150] sm:$0xff]  ;;  %v629_v45 = vld [vmem:[%s2757_s22 + $0x168] sm:$0xff]  ;;  %v631_v46 = vld [vmem:[%s2757_s22 + $0x178] sm:$0xff] }
  0x84   : > { %2039 = vmatpush1.bf16.xpose.msra.mxu0 %v2251_v49  ;;  %2071 = vmatpush1.bf16.xpose.msra.mxu1 %v2252_v50  ;;  %v628_v47 = vld [vmem:[%s2757_s22 + $0x160] sm:$0xff]  ;;  %v630_v48 = vld [vmem:[%s2757_s22 + $0x170] sm:$0xff]  ;;  %v633_v49 = vld [vmem:[%s2757_s22 + $0x188] sm:$0xff] }
  0x85   : > { %2041 = vmatprep.subr.bf16.mxu0 %v2253_v51  ;;  %2073 = vmatprep.subr.bf16.mxu1 %v2255_v52  ;;  %v635_v50 = vld [vmem:[%s2757_s22 + $0x198] sm:$0xff]  ;;  %v632_v51 = vld [vmem:[%s2757_s22 + $0x180] sm:$0xff]  ;;  %v634_v52 = vld [vmem:[%s2757_s22 + $0x190] sm:$0xff] }
  0x8c   : > { %2043 = vmatpush1.bf16.xpose.msra.mxu0 %v2257_v53  ;;  %2075 = vmatpush1.bf16.xpose.msra.mxu1 %v2258_v54  ;;  %v637_v53 = vld [vmem:[%s2757_s22 + $0x1a8] sm:$0xff]  ;;  %v639_v54 = vld [vmem:[%s2757_s22 + $0x1b8] sm:$0xff] }
  0x8d   : > { %2045 = vmatprep.subr.bf16.mxu0 %v2259_v55  ;;  %2077 = vmatprep.subr.bf16.mxu1 %v2261_v56  ;;  %v636_v55 = vld [vmem:[%s2757_s22 + $0x1a0] sm:$0xff]  ;;  %v638_v56 = vld [vmem:[%s2757_s22 + $0x1b0] sm:$0xff] }
  0x94   : > { %2047 = vmatpush1.bf16.xpose.msra.mxu0 %v2263_v57  ;;  %2079 = vmatpush1.bf16.xpose.msra.mxu1 %v2264_v58  ;;  %v641_v57 = vld [vmem:[%s2757_s22 + $0x1c8] sm:$0xff]  ;;  %v643_v58 = vld [vmem:[%s2757_s22 + $0x1d8] sm:$0xff] }
  0x95   : > { %2049 = vmatprep.subr.bf16.mxu0 %v2265_v59  ;;  %2081 = vmatprep.subr.bf16.mxu1 %v2267_v60  ;;  %v640_v59 = vld [vmem:[%s2757_s22 + $0x1c0] sm:$0xff]  ;;  %v642_v60 = vld [vmem:[%s2757_s22 + $0x1d0] sm:$0xff] }
  0x9c   : > { %2051 = vmatpush1.bf16.xpose.msra.mxu0 %v2269_v61  ;;  %2083 = vmatpush1.bf16.xpose.msra.mxu1 %v2270_v62  ;;  %v645_v61 = vld [vmem:[%s2757_s22 + $0x1e8] sm:$0xff]  ;;  %v647_v62 = vld [vmem:[%s2757_s22 + $0x1f8] sm:$0xff] }
  0x9d   : > { %2053 = vmatprep.subr.bf16.mxu0 %v2271_v63  ;;  %2085 = vmatprep.subr.bf16.mxu1 %v2273_v0  ;;  %v644_v63 = vld [vmem:[%s2757_s22 + $0x1e0] sm:$0xff]  ;;  %v646_v0 = vld [vmem:[%s2757_s22 + $0x1f0] sm:$0xff] }
  0xa4   : > { %2055 = vmatpush1.bf16.xpose.msra.mxu0 %v2275_v1  ;;  %2087 = vmatpush1.bf16.xpose.msra.mxu1 %v2276_v2  ;;  %v568_v2 = vld [vmem:[#allocation2] sm:$0xff] }
  0xab   : > { %809 = vmatmul.mubr.f32.vlgmr.msra.gmra.mrb[0].mxu0 %v584_v3  ;;  %954 = vmatmul.mubr.f32.vlgmr.msra.gmra.mrb[0].mxu1 %v586_v4 }
  0xac   : > { %813 = vmatprep.mubr.f32.mxu0 %v589_v5  ;;  %958 = vmatprep.mubr.f32.mxu1 %v591_v6 }
  0xaf   : > { %814 = vmatmul.mubr.f32.gmra.mrb[2].mxu0 %v588_v7  ;;  %959 = vmatmul.mubr.f32.gmra.mrb[2].mxu1 %v590_v8 }
  0xb0   : > { %818 = vmatprep.mubr.f32.mxu0 %v593_v9  ;;  %963 = vmatprep.mubr.f32.mxu1 %v595_v10  ;;  %v569_v9 = vld [vmem:[#allocation2 + $0x8] sm:$0xff] }
  0xb3   : > { %819 = vmatmul.mubr.f32.gmra.mrb[4].mxu0 %v592_v11  ;;  %964 = vmatmul.mubr.f32.gmra.mrb[4].mxu1 %v594_v12 }
  0xb4   : > { %823 = vmatprep.mubr.f32.mxu0 %v597_v13  ;;  %968 = vmatprep.mubr.f32.mxu1 %v599_v14 }
  0xb7   : > { %824 = vmatmul.mubr.f32.gmra.mrb[6].mxu0 %v596_v15  ;;  %969 = vmatmul.mubr.f32.gmra.mrb[6].mxu1 %v598_v16  ;;  %v570_v16 = vld [vmem:[#allocation2 + $0x10] sm:$0xff] }
  0xb8   : > { %828 = vmatprep.mubr.f32.mxu0 %v601_v17  ;;  %973 = vmatprep.mubr.f32.mxu1 %v603_v18 }
  0xbb   : > { %829 = vmatmul.mubr.f32.gmra.mrb[8].mxu0 %v600_v19  ;;  %974 = vmatmul.mubr.f32.gmra.mrb[8].mxu1 %v602_v20 }
  0xbc   : > { %833 = vmatprep.mubr.f32.mxu0 %v605_v21  ;;  %978 = vmatprep.mubr.f32.mxu1 %v607_v22 }
  0xbf   : > { %834 = vmatmul.mubr.f32.gmra.mrb[10].mxu0 %v604_v23  ;;  %979 = vmatmul.mubr.f32.gmra.mrb[10].mxu1 %v606_v24  ;;  %v571_v23 = vld [vmem:[#allocation2 + $0x18] sm:$0xff] }
  0xc0   : > { %838 = vmatprep.mubr.f32.mxu0 %v609_v25  ;;  %983 = vmatprep.mubr.f32.mxu1 %v611_v26 }
  0xc3   : > { %839 = vmatmul.mubr.f32.gmra.mrb[12].mxu0 %v608_v27  ;;  %984 = vmatmul.mubr.f32.gmra.mrb[12].mxu1 %v610_v28 }
  0xc4   : > { %843 = vmatprep.mubr.f32.mxu0 %v613_v29  ;;  %988 = vmatprep.mubr.f32.mxu1 %v615_v30  ;;  %v572_v30 = vld [vmem:[#allocation2 + $0x20] sm:$0xff] }
  0xc7   : > { %844 = vmatmul.mubr.f32.gmra.mrb[14].mxu0 %v612_v31  ;;  %989 = vmatmul.mubr.f32.gmra.mrb[14].mxu1 %v614_v32 }
  0xc8   : > { %848 = vmatprep.mubr.f32.mxu0 %v617_v33  ;;  %993 = vmatprep.mubr.f32.mxu1 %v619_v34 }
  0xcb   : > { %849 = vmatmul.mubr.f32.gmra.mrb[16].mxu0 %v616_v35  ;;  %994 = vmatmul.mubr.f32.gmra.mrb[16].mxu1 %v618_v36 }
  0xcc   : > { %853 = vmatprep.mubr.f32.mxu0 %v621_v37  ;;  %998 = vmatprep.mubr.f32.mxu1 %v623_v38  ;;  %v573_v37 = vld [vmem:[#allocation2 + $0x28] sm:$0xff] }
  0xcf   : > { %854 = vmatmul.mubr.f32.gmra.mrb[18].mxu0 %v620_v39  ;;  %999 = vmatmul.mubr.f32.gmra.mrb[18].mxu1 %v622_v40 }
  0xd0   : > { %858 = vmatprep.mubr.f32.mxu0 %v625_v41  ;;  %1003 = vmatprep.mubr.f32.mxu1 %v627_v42 }
  0xd3   : > { %859 = vmatmul.mubr.f32.gmra.mrb[20].mxu0 %v624_v43  ;;  %1004 = vmatmul.mubr.f32.gmra.mrb[20].mxu1 %v626_v44  ;;  %v574_v44 = vld [vmem:[#allocation2 + $0x30] sm:$0xff] }
  0xd4   : > { %863 = vmatprep.mubr.f32.mxu0 %v629_v45  ;;  %1008 = vmatprep.mubr.f32.mxu1 %v631_v46 }
  0xd7   : > { %864 = vmatmul.mubr.f32.gmra.mrb[22].mxu0 %v628_v47  ;;  %1009 = vmatmul.mubr.f32.gmra.mrb[22].mxu1 %v630_v48 }
  0xd8   : > { %868 = vmatprep.mubr.f32.mxu0 %v633_v49  ;;  %1013 = vmatprep.mubr.f32.mxu1 %v635_v50 }
  0xdb   : > { %869 = vmatmul.mubr.f32.gmra.mrb[24].mxu0 %v632_v51  ;;  %1014 = vmatmul.mubr.f32.gmra.mrb[24].mxu1 %v634_v52  ;;  %v575_v51 = vld [vmem:[#allocation2 + $0x38] sm:$0xff] }
  0xdc   : > { %873 = vmatprep.mubr.f32.mxu0 %v637_v53  ;;  %1018 = vmatprep.mubr.f32.mxu1 %v639_v54 }
  0xdf   : > { %874 = vmatmul.mubr.f32.gmra.mrb[26].mxu0 %v636_v55  ;;  %1019 = vmatmul.mubr.f32.gmra.mrb[26].mxu1 %v638_v56 }
  0xe0   : > { %878 = vmatprep.mubr.f32.mxu0 %v641_v57  ;;  %1023 = vmatprep.mubr.f32.mxu1 %v643_v58  ;;  %v576_v58 = vld [vmem:[#allocation2 + $0x40] sm:$0xff] }
  0xe3   : > { %879 = vmatmul.mubr.f32.gmra.mrb[28].mxu0 %v640_v59  ;;  %1024 = vmatmul.mubr.f32.gmra.mrb[28].mxu1 %v642_v60 }
  0xe4   : > { %883 = vmatprep.mubr.f32.mxu0 %v645_v61  ;;  %1028 = vmatprep.mubr.f32.mxu1 %v647_v62 }
  0xe7   : > { %884 = vmatmul.mubr.f32.gmra.mrb[30].mxu0 %v644_v63  ;;  %1029 = vmatmul.mubr.f32.gmra.mrb[30].mxu1 %v646_v0 }
 0x17e   : > { %v810_v1 = vpop.f32.mrb[0].mxu0  ;;  %v955_v3 = vpop.f32.mrb[0].mxu1 }
 0x17f   : > { %v956_v4 = vadd.f32 %v955_v3, %v810_v1  ;;  %v812_v5 = vpop.f32.mrb[1].mxu0  ;;  %v957_v6 = vpop.f32.mrb[1].mxu1  ;;  %v577_v1 = vld [vmem:[#allocation2 + $0x48] sm:$0xff] }
 0x181   : > { %v1034_v7 = vadd.f32 %v956_v4, %v568_v2 }
 0x182   : > { %v815_v8 = vpop.f32.mrb[2].mxu0  ;;  %v960_v10 = vpop.f32.mrb[2].mxu1 }
 0x183   : > { %1050 = vst [vmem:[#allocation2] sm:$0xff] %v1034_v7  ;;  %v961_v11 = vadd.f32 %v960_v10, %v815_v8  ;;  %v817_v12 = vpop.f32.mrb[3].mxu0  ;;  %v962_v13 = vpop.f32.mrb[3].mxu1  ;;  %v578_v8 = vld [vmem:[#allocation2 + $0x50] sm:$0xff] }
 0x185   : > { %v1035_v14 = vadd.f32 %v961_v11, %v569_v9 }
 0x186   : > { %v820_v15 = vpop.f32.mrb[4].mxu0  ;;  %v965_v17 = vpop.f32.mrb[4].mxu1 }
 0x187   : > { %1051 = vst [vmem:[#allocation2 + $0x8] sm:$0xff] %v1035_v14  ;;  %v966_v18 = vadd.f32 %v965_v17, %v820_v15  ;;  %v822_v19 = vpop.f32.mrb[5].mxu0  ;;  %v967_v20 = vpop.f32.mrb[5].mxu1  ;;  %v579_v15 = vld [vmem:[#allocation2 + $0x58] sm:$0xff] }
 0x189   : > { %v1036_v21 = vadd.f32 %v966_v18, %v570_v16 }
 0x18a   : > { %v825_v22 = vpop.f32.mrb[6].mxu0  ;;  %v970_v24 = vpop.f32.mrb[6].mxu1 }
 0x18b   : > { %1052 = vst [vmem:[#allocation2 + $0x10] sm:$0xff] %v1036_v21  ;;  %v971_v25 = vadd.f32 %v970_v24, %v825_v22  ;;  %v827_v26 = vpop.f32.mrb[7].mxu0  ;;  %v972_v27 = vpop.f32.mrb[7].mxu1  ;;  %v580_v22 = vld [vmem:[#allocation2 + $0x60] sm:$0xff] }
 0x18d   : > { %v1037_v28 = vadd.f32 %v971_v25, %v571_v23 }
 0x18e   : > { %v830_v29 = vpop.f32.mrb[8].mxu0  ;;  %v975_v31 = vpop.f32.mrb[8].mxu1 }
 0x18f   : > { %1053 = vst [vmem:[#allocation2 + $0x18] sm:$0xff] %v1037_v28  ;;  %v976_v32 = vadd.f32 %v975_v31, %v830_v29  ;;  %v832_v33 = vpop.f32.mrb[9].mxu0  ;;  %v977_v34 = vpop.f32.mrb[9].mxu1  ;;  %v581_v29 = vld [vmem:[#allocation2 + $0x68] sm:$0xff] }
 0x191   : > { %v1038_v35 = vadd.f32 %v976_v32, %v572_v30 }
 0x192   : > { %v835_v36 = vpop.f32.mrb[10].mxu0  ;;  %v980_v38 = vpop.f32.mrb[10].mxu1 }
 0x193   : > { %1054 = vst [vmem:[#allocation2 + $0x20] sm:$0xff] %v1038_v35  ;;  %v981_v39 = vadd.f32 %v980_v38, %v835_v36  ;;  %v837_v40 = vpop.f32.mrb[11].mxu0  ;;  %v982_v41 = vpop.f32.mrb[11].mxu1  ;;  %v582_v36 = vld [vmem:[#allocation2 + $0x70] sm:$0xff] }
 0x195   : > { %v1039_v42 = vadd.f32 %v981_v39, %v573_v37 }
 0x196   : > { %v840_v43 = vpop.f32.mrb[12].mxu0  ;;  %v985_v45 = vpop.f32.mrb[12].mxu1 }
 0x197   : > { %1055 = vst [vmem:[#allocation2 + $0x28] sm:$0xff] %v1039_v42  ;;  %v986_v46 = vadd.f32 %v985_v45, %v840_v43  ;;  %v842_v47 = vpop.f32.mrb[13].mxu0  ;;  %v987_v48 = vpop.f32.mrb[13].mxu1  ;;  %v583_v43 = vld [vmem:[#allocation2 + $0x78] sm:$0xff] }
 0x199   : > { %v1040_v49 = vadd.f32 %v986_v46, %v574_v44 }
 0x19a   : > { %v845_v50 = vpop.f32.mrb[14].mxu0  ;;  %v990_v52 = vpop.f32.mrb[14].mxu1 }
 0x19b   : > { %1056 = vst [vmem:[#allocation2 + $0x30] sm:$0xff] %v1040_v49  ;;  %v991_v53 = vadd.f32 %v990_v52, %v845_v50  ;;  %v847_v54 = vpop.f32.mrb[15].mxu0  ;;  %v992_v55 = vpop.f32.mrb[15].mxu1  ;;  %v1157_v49 = vld [vmem:[%s3138_s3] sm:$0xff] (!%p1866_p1)  ;;  %v1158_v50 = vld [vmem:[%s3138_s3 + $0x8] sm:$0xff] (!%p1866_p1) }
 0x19c   : > { %v2088_v52 = vpack.c.bf16 (!%p1866_p1), %v1158_v50, %v1157_v49  ;;  %v1161_v55 = vld [vmem:[%s3138_s3 + $0x20] sm:$0xff] (!%p1866_p1) }
 0x19d   : > { %v1041_v56 = vadd.f32 %v991_v53, %v575_v51  ;;  %v1159_v51 = vld [vmem:[%s3138_s3 + $0x10] sm:$0xff] (!%p1866_p1)  ;;  %v1160_v53 = vld [vmem:[%s3138_s3 + $0x18] sm:$0xff] (!%p1866_p1) }
 0x19e   : > { %v850_v57 = vpop.f32.mrb[16].mxu0  ;;  %v995_v59 = vpop.f32.mrb[16].mxu1  ;;  %v2092_v54 = vpack.c.bf16 (!%p1866_p1), %v1160_v53, %v1159_v51  ;;  %2089 = vmatprep.subr.bf16.mxu0 (!%p1866_p1), %v2088_v52 }
 0x19f   : > { %1057 = vst [vmem:[#allocation2 + $0x38] sm:$0xff] %v1041_v56  ;;  %v996_v60 = vadd.f32 %v995_v59, %v850_v57  ;;  %v852_v61 = vpop.f32.mrb[17].mxu0  ;;  %v997_v62 = vpop.f32.mrb[17].mxu1  ;;  %v1162_v56 = vld [vmem:[%s3138_s3 + $0x28] sm:$0xff] (!%p1866_p1)  ;;  %2091 = vmatpush3.bf16.msra.mxu0 (!%p1866_p1), %v2088_v52  ;;  %v2880_v59 = vld [vmem:[%s3137_s2] ss:$0 sm:$0xff] (!%p1866_p1) }
 0x1a0   : > { %2093 = vmatprep.subr.bf16.mxu0 (!%p1866_p1), %v2092_v54  ;;  %v2096_v57 = vpack.c.bf16 (!%p1866_p1), %v1162_v56, %v1161_v55  ;;  %v1164_v61 = vld [vmem:[%s3138_s3 + $0x38] sm:$0xff] (!%p1866_p1) }
 0x1a1   : > { %v1042_v63 = vadd.f32 %v996_v60, %v576_v58  ;;  %v1070_v58 = vld [vmem:[#allocation2] sm:$0xff] (!%p1866_p1)  ;;  %v1163_v60 = vld [vmem:[%s3138_s3 + $0x30] sm:$0xff] (!%p1866_p1) }
 0x1a2   : > { %v855_v0 = vpop.f32.mrb[18].mxu0  ;;  %v1000_v2 = vpop.f32.mrb[18].mxu1  ;;  %v1093_v62 = vadd.f32 (!%p1866_p1), %v2880_v59, %v1070_v58 }
 0x1a3   : > { %1058 = vst [vmem:[#allocation2 + $0x40] sm:$0xff] %v1042_v63  ;;  %v1001_v3 = vadd.f32 %v1000_v2, %v855_v0  ;;  %v857_v4 = vpop.f32.mrb[19].mxu0  ;;  %v1002_v5 = vpop.f32.mrb[19].mxu1  ;;  %2095 = vmatpush3.bf16.msra.mxu0 (!%p1866_p1), %v2092_v54  ;;  %v2100_v0 = vpack.c.bf16 (!%p1866_p1), %v1164_v61, %v1163_v60  ;;  %v1166_v2 = vld [vmem:[%s3138_s3 + $0x48] sm:$0xff] (!%p1866_p1) }
 0x1a4   : > { %vm1109_vm0 = vcmp.gt.f32.partialorder (!%p1866_p1), %v1093_v62, 0.0  ;;  %v1125_v63 = vmul.f32 (!%p1866_p1), 0.01, %v1093_v62  ;;  %2097 = vmatprep.subr.bf16.mxu0 (!%p1866_p1), %v2096_v57  ;;  %v1167_v5 = vld [vmem:[%s3138_s3 + $0x50] sm:$0xff] (!%p1866_p1) }
 0x1a5   : > { %v1043_v6 = vadd.f32 %v1001_v3, %v577_v1  ;;  %v1165_v1 = vld [vmem:[%s3138_s3 + $0x40] sm:$0xff] (!%p1866_p1) }
 0x1a6   : > { %v860_v7 = vpop.f32.mrb[20].mxu0  ;;  %v1005_v9 = vpop.f32.mrb[20].mxu1  ;;  %v1141_v3 = vsel (!%p1866_p1), %vm1109_vm0, %v1093_v62, %v1125_v63  ;;  %v2104_v4 = vpack.c.bf16 (!%p1866_p1), %v1166_v2, %v1165_v1 }
 0x1a7   : > { %1059 = vst [vmem:[#allocation2 + $0x48] sm:$0xff] %v1043_v6  ;;  %v1006_v10 = vadd.f32 %v1005_v9, %v860_v7  ;;  %v862_v11 = vpop.f32.mrb[21].mxu0  ;;  %v1007_v12 = vpop.f32.mrb[21].mxu1  ;;  %1972 = vmatprep.mubr.f32.mxu0 (!%p1866_p1), %v1141_v3  ;;  %2099 = vmatpush3.bf16.msra.mxu0 (!%p1866_p1), %v2096_v57  ;;  %v1168_v6 = vld [vmem:[%s3138_s3 + $0x58] sm:$0xff] (!%p1866_p1)  ;;  %v1170_v9 = vld [vmem:[%s3138_s3 + $0x68] sm:$0xff] (!%p1866_p1) }
 0x1a8   : > { %2101 = vmatprep.subr.bf16.mxu0 (!%p1866_p1), %v2100_v0  ;;  %v2108_v7 = vpack.c.bf16 (!%p1866_p1), %v1168_v6, %v1167_v5  ;;  %v1071_v11 = vld [vmem:[#allocation2 + $0x8] sm:$0xff] (!%p1866_p1)  ;;  %v1171_v12 = vld [vmem:[%s3138_s3 + $0x70] sm:$0xff] (!%p1866_p1) }
 0x1a9   : > { %v1044_v13 = vadd.f32 %v1006_v10, %v578_v8  ;;  %v1169_v8 = vld [vmem:[%s3138_s3 + $0x60] sm:$0xff] (!%p1866_p1) }
 0x1aa   : > { %v865_v14 = vpop.f32.mrb[22].mxu0  ;;  %v1010_v16 = vpop.f32.mrb[22].mxu1  ;;  %v2112_v10 = vpack.c.bf16 (!%p1866_p1), %v1170_v9, %v1169_v8 }
 0x1ab   : > { %1060 = vst [vmem:[#allocation2 + $0x50] sm:$0xff] %v1044_v13  ;;  %v1011_v17 = vadd.f32 %v1010_v16, %v865_v14  ;;  %v867_v18 = vpop.f32.mrb[23].mxu0  ;;  %v1012_v19 = vpop.f32.mrb[23].mxu1  ;;  %2103 = vmatpush3.bf16.msra.mxu0 (!%p1866_p1), %v2100_v0  ;;  %v1172_v13 = vld [vmem:[%s3138_s3 + $0x78] sm:$0xff] (!%p1866_p1)  ;;  %v1072_v14 = vld [vmem:[#allocation2 + $0x10] sm:$0xff] (!%p1866_p1) }
 0x1ac   : > { %2105 = vmatprep.subr.bf16.mxu0 (!%p1866_p1), %v2104_v4  ;;  %v2116_v16 = vpack.c.bf16 (!%p1866_p1), %v1172_v13, %v1171_v12  ;;  %v1073_v18 = vld [vmem:[#allocation2 + $0x18] sm:$0xff] (!%p1866_p1)  ;;  %v1074_v19 = vld [vmem:[#allocation2 + $0x20] sm:$0xff] (!%p1866_p1) }
 0x1ad   : > { %v1045_v20 = vadd.f32 %v1011_v17, %v579_v15  ;;  %v1094_v15 = vadd.f32 (!%p1866_p1), %v2880_v59, %v1071_v11  ;;  %v1095_v17 = vadd.f32 (!%p1866_p1), %v2880_v59, %v1072_v14  ;;  %v1373_v11 = vld [vmem:[%s3140_s5] sm:$0xff] (!%p1866_p1) }
 0x1ae   : > { %v870_v21 = vpop.f32.mrb[24].mxu0  ;;  %v1015_v23 = vpop.f32.mrb[24].mxu1  ;;  %v2937_v13 = vld [vmem:[%s3139_s4] ss:$0 sm:$0xff] (!%p1866_p1) }
 0x1af   : > { %1061 = vst [vmem:[#allocation2 + $0x58] sm:$0xff] %v1045_v20  ;;  %v1016_v24 = vadd.f32 %v1015_v23, %v870_v21  ;;  %v872_v25 = vpop.f32.mrb[25].mxu0  ;;  %v1017_v26 = vpop.f32.mrb[25].mxu1  ;;  %2107 = vmatpush3.bf16.msra.mxu0 (!%p1866_p1), %v2104_v4  ;;  %v1126_v20 = vmul.f32 (!%p1866_p1), 0.01, %v1094_v15  ;;  %v1096_v21 = vadd.f32 (!%p1866_p1), %v2880_v59, %v1073_v18  ;;  %vm1110_vm1 = vcmp.gt.f32.partialorder (!%p1866_p1), %v1094_v15, 0.0 }
 0x1b0   : > { %2109 = vmatprep.subr.bf16.mxu0 (!%p1866_p1), %v2108_v7  ;;  %v1097_v23 = vadd.f32 (!%p1866_p1), %v2880_v59, %v1074_v19  ;;  %vm1111_vm2 = vcmp.gt.f32.partialorder (!%p1866_p1), %v1095_v17, 0.0  ;;  %v1076_v25 = vld [vmem:[#allocation2 + $0x30] sm:$0xff] (!%p1866_p1) }
 0x1b1   : > { %v1046_v27 = vadd.f32 %v1016_v24, %v580_v22  ;;  %v1127_v22 = vmul.f32 (!%p1866_p1), 0.01, %v1095_v17  ;;  %v1075_v24 = vld [vmem:[#allocation2 + $0x28] sm:$0xff] (!%p1866_p1)  ;;  %v1142_v26 = vsel (!%p1866_p1), %vm1110_vm1, %v1094_v15, %v1126_v20  ;;  %vm1112_vm3 = vcmp.gt.f32.partialorder (!%p1866_p1), %v1096_v21, 0.0 }
 0x1b2   : > { %v875_v28 = vpop.f32.mrb[26].mxu0  ;;  %v1020_v30 = vpop.f32.mrb[26].mxu1  ;;  %vm1113_vm4 = vcmp.gt.f32.partialorder (!%p1866_p1), %v1097_v23, 0.0 }
 0x1b3   : > { %1062 = vst [vmem:[#allocation2 + $0x60] sm:$0xff] %v1046_v27  ;;  %v1021_v31 = vadd.f32 %v1020_v30, %v875_v28  ;;  %v877_v32 = vpop.f32.mrb[27].mxu0  ;;  %v1022_v33 = vpop.f32.mrb[27].mxu1  ;;  %2111 = vmatpush3.bf16.msra.mxu0 (!%p1866_p1), %v2108_v7  ;;  %v1128_v27 = vmul.f32 (!%p1866_p1), 0.01, %v1096_v21  ;;  %v1098_v28 = vadd.f32 (!%p1866_p1), %v2880_v59, %v1075_v24 }
 0x1b4   : > { %2113 = vmatprep.subr.bf16.mxu0 (!%p1866_p1), %v2112_v10  ;;  %v1129_v30 = vmul.f32 (!%p1866_p1), 0.01, %v1097_v23  ;;  %v1077_v32 = vld [vmem:[#allocation2 + $0x38] sm:$0xff] (!%p1866_p1)  ;;  %v1078_v33 = vld [vmem:[#allocation2 + $0x40] sm:$0xff] (!%p1866_p1) }
 0x1b5   : > { %v1047_v34 = vadd.f32 %v1021_v31, %v581_v29  ;;  %v1143_v29 = vsel (!%p1866_p1), %vm1111_vm2, %v1095_v17, %v1127_v22  ;;  %v1099_v31 = vadd.f32 (!%p1866_p1), %v2880_v59, %v1076_v25  ;;  %vm1114_vm5 = vcmp.gt.f32.partialorder (!%p1866_p1), %v1098_v28, 0.0 }
 0x1b6   : > { %v880_v35 = vpop.f32.mrb[28].mxu0  ;;  %v1025_v37 = vpop.f32.mrb[28].mxu1  ;;  %vm1382_vm2 = vcmask (!%p1866_p1), 130048  }
 0x1b7   : > { %1063 = vst [vmem:[#allocation2 + $0x68] sm:$0xff] %v1047_v34  ;;  %v1026_v38 = vadd.f32 %v1025_v37, %v880_v35  ;;  %v882_v39 = vpop.f32.mrb[29].mxu0  ;;  %v1027_v40 = vpop.f32.mrb[29].mxu1  ;;  %2115 = vmatpush3.bf16.msra.mxu0 (!%p1866_p1), %v2112_v10  ;;  %v1144_v34 = vsel (!%p1866_p1), %vm1112_vm3, %v1096_v21, %v1128_v27  ;;  %v1130_v35 = vmul.f32 (!%p1866_p1), 0.01, %v1098_v28  ;;  %v1145_v37 = vsel (!%p1866_p1), %vm1113_vm4, %v1097_v23, %v1129_v30 }
 0x1b8   : > { %2117 = vmatprep.subr.bf16.mxu0 (!%p1866_p1), %v2116_v16  ;;  %v1101_v39 = vadd.f32 (!%p1866_p1), %v2880_v59, %v1078_v33  ;;  %v1079_v40 = vld [vmem:[#allocation2 + $0x48] sm:$0xff] (!%p1866_p1)  ;;  %vm1115_vm6 = vcmp.gt.f32.partialorder (!%p1866_p1), %v1099_v31, 0.0 }
 0x1b9   : > { %v1048_v41 = vadd.f32 %v1026_v38, %v582_v36  ;;  %1069 = sbr.rel (%p1866_p1) target bundleno = 946 (0x3b2), region = 102  ;;  %v1100_v36 = vadd.f32 (!%p1866_p1), %v2880_v59, %v1077_v32  ;;  %v1131_v38 = vmul.f32 (!%p1866_p1), 0.01, %v1099_v31 }
 0x1ba   : > { %v885_v42 = vpop.f32.mrb[30].mxu0  ;;  %v1030_v44 = vpop.f32.mrb[30].mxu1  ;;  %vm1117_vm8 = vcmp.gt.f32.partialorder (!%p1866_p1), %v1101_v39, 0.0  ;;  %v1082_v49 = vld [vmem:[#allocation2 + $0x60] sm:$0xff] (!%p1866_p1) }
 0x1bb   : > { %1064 = vst [vmem:[#allocation2 + $0x70] sm:$0xff] %v1048_v41  ;;  %v1031_v45 = vadd.f32 %v1030_v44, %v885_v42  ;;  %v887_v46 = vpop.f32.mrb[31].mxu0  ;;  %v1032_v47 = vpop.f32.mrb[31].mxu1  ;;  %2119 = vmatpush3.bf16.msra.mxu0 (!%p1866_p1), %v2116_v16  ;;  %v1080_v41 = vld [vmem:[#allocation2 + $0x50] sm:$0xff] (!%p1866_p1)  ;;  %v1146_v42 = vsel (!%p1866_p1), %vm1114_vm5, %v1098_v28, %v1130_v35  ;;  %v1102_v44 = vadd.f32 (!%p1866_p1), %v2880_v59, %v1079_v40  ;;  %vm1116_vm7 = vcmp.gt.f32.partialorder (!%p1866_p1), %v1100_v36, 0.0 }
 0x1bc   : > { %v1133_v46 = vmul.f32 (!%p1866_p1), 0.01, %v1101_v39  ;;  %v1103_v47 = vadd.f32 (!%p1866_p1), %v2880_v59, %v1080_v41  ;;  %v1105_v55 = vadd.f32 (!%p1866_p1), %v2880_v59, %v1082_v49 }
 0x1bd   : > { %v1049_v48 = vadd.f32 %v1031_v45, %v583_v43  ;;  %v1132_v43 = vmul.f32 (!%p1866_p1), 0.01, %v1100_v36  ;;  %v1147_v45 = vsel (!%p1866_p1), %vm1115_vm6, %v1099_v31, %v1131_v38  ;;  %v1134_v51 = vmul.f32 (!%p1866_p1), 0.01, %v1102_v44 }
 0x1be   : > { %1973 = vmatmul.mubr.f32.vlgmr.msra.gmra.mrb[0].mxu0 (!%p1866_p1), %v1142_v26  ;;  %v1149_v53 = vsel (!%p1866_p1), %vm1117_vm8, %v1101_v39, %v1133_v46  ;;  %vm1118_vm9 = vcmp.gt.f32.partialorder (!%p1866_p1), %v1102_v44, 0.0  ;;  %v1135_v54 = vmul.f32 (!%p1866_p1), 0.01, %v1103_v47  ;;  %v1083_v56 = vld [vmem:[#allocation2 + $0x68] sm:$0xff] (!%p1866_p1)  ;;  %vm1119_vm10 = vcmp.gt.f32.partialorder (!%p1866_p1), %v1103_v47, 0.0 }
 0x1bf   : > { %1065 = vst [vmem:[#allocation2 + $0x78] sm:$0xff] %v1049_v48  ;;  %1975 = vmatprep.mubr.f32.mxu0 (!%p1866_p1), %v1143_v29  ;;  %v1081_v48 = vld [vmem:[#allocation2 + $0x58] sm:$0xff] (!%p1866_p1)  ;;  %v1148_v50 = vsel (!%p1866_p1), %vm1116_vm7, %v1100_v36, %v1132_v43  ;;  %v1150_v58 = vsel (!%p1866_p1), %vm1118_vm9, %v1102_v44, %v1134_v51  ;;  %v1106_v61 = vadd.f32 (!%p1866_p1), %v2880_v59, %v1083_v56  ;;  %v1137_v63 = vmul.f32 (!%p1866_p1), 0.01, %v1105_v55 }
 0x1c0   : > { %v1104_v52 = vadd.f32 %v2880_v59, %v1081_v48  ;;  %v1151_v62 = vsel %vm1119_vm10, %v1103_v47, %v1135_v54  ;;  %vm1121_vm12 = vcmp.gt.f32.partialorder %v1105_v55, 0.0 }
 0x1c1   : > { %v1138_v3 = vmul.f32 0.01, %v1106_v61  ;;  %v1153_v5 = vsel %vm1121_vm12, %v1105_v55, %v1137_v63  ;;  %vm1122_vm13 = vcmp.gt.f32.partialorder %v1106_v61, 0.0 }
 0x1c2   : > { %1976 = vmatmul.mubr.f32.gmra.mrb[2].mxu0 %v1144_v34  ;;  %v1084_v57 = vld [vmem:[#allocation2 + $0x70] sm:$0xff]  ;;  %v1136_v60 = vmul.f32 0.01, %v1104_v52  ;;  %vm1120_vm11 = vcmp.gt.f32.partialorder %v1104_v52, 0.0 }
 0x1c3   : > { %1978 = vmatprep.mubr.f32.mxu0 %v1145_v37  ;;  %v1107_v0 = vadd.f32 %v2880_v59, %v1084_v57  ;;  %v1154_v7 = vsel %vm1122_vm13, %v1106_v61, %v1138_v3 }
 0x1c4   : > { %v1152_v2 = vsel %vm1120_vm11, %v1104_v52, %v1136_v60 }
 0x1c5   : > { %v1139_v6 = vmul.f32 0.01, %v1107_v0  ;;  %vm1123_vm14 = vcmp.gt.f32.partialorder %v1107_v0, 0.0 }
 0x1c6   : > { %1979 = vmatmul.mubr.f32.gmra.mrb[4].mxu0 %v1146_v42  ;;  %v1085_v1 = vld [vmem:[#allocation2 + $0x78] sm:$0xff] }
 0x1c7   : > { %1981 = vmatprep.mubr.f32.mxu0 %v1147_v45  ;;  %v1108_v4 = vadd.f32 %v2880_v59, %v1085_v1  ;;  %v1155_v9 = vsel %vm1123_vm14, %v1107_v0, %v1139_v6  ;;  %v1374_v59 = vld [vmem:[%s3140_s5 + $0x8] sm:$0xff] }
 0x1c8   : > { %v2120_v12 = vpack.c.bf16 %v1374_v59, %v1373_v11 }
 0x1c9   : > { %v1140_v8 = vmul.f32 0.01, %v1108_v4  ;;  %vm1124_vm15 = vcmp.gt.f32.partialorder %v1108_v4, 0.0 }
 0x1ca   : > { %1982 = vmatmul.mubr.f32.gmra.mrb[6].mxu0 %v1148_v50  ;;  %2121 = vmatprep.subr.bf16.mxu1 %v2120_v12 }
 0x1cb   : > { %1984 = vmatprep.mubr.f32.mxu0 %v1149_v53  ;;  %v1156_v10 = vsel %vm1124_vm15, %v1108_v4, %v1140_v8  ;;  %2123 = vmatpush3.bf16.msra.mxu1 %v2120_v12 }
 0x1ce   : > { %1985 = vmatmul.mubr.f32.gmra.mrb[8].mxu0 %v1150_v58 }
 0x1cf   : > { %1987 = vmatprep.mubr.f32.mxu0 %v1151_v62 }
 0x1d2   : > { %1988 = vmatmul.mubr.f32.gmra.mrb[10].mxu0 %v1152_v2 }
 0x1d3   : > { %1990 = vmatprep.mubr.f32.mxu0 %v1153_v5 }
 0x1d6   : > { %1991 = vmatmul.mubr.f32.gmra.mrb[12].mxu0 %v1154_v7 }
 0x1d7   : > { %1993 = vmatprep.mubr.f32.mxu0 %v1155_v9 }
 0x1da   : > { %1994 = vmatmul.mubr.f32.gmra.mrb[14].mxu0 %v1156_v10 }
 0x291   : > { %v1974_v14 = vpop.f32.mrb[0].mxu0 }
 0x292   : > { %v1252_v15 = vadd.f32 %v1974_v14, %v2937_v13  ;;  %v1246_v16 = vpop.f32.mrb[1].mxu0 }
 0x293   : > { %v1247_v17 = vadd.f32 %v2937_v13, %v1246_v16 }
 0x294   : > { %v1342_v18 = vmul.f32 0.01, %v1252_v15  ;;  %vm1326_vm0 = vcmp.gt.f32.partialorder %v1252_v15, 0.0 }
 0x295   : > { %v1977_v19 = vpop.f32.mrb[2].mxu0  ;;  %vm1325_vm1 = vcmp.gt.f32.partialorder %v1247_v17, 0.0  ;;  %v1341_v20 = vmul.f32 0.01, %v1247_v17 }
 0x296   : > { %v1262_v21 = vadd.f32 %v1977_v19, %v2937_v13  ;;  %v1256_v22 = vpop.f32.mrb[3].mxu0  ;;  %v1358_v26 = vsel %vm1326_vm0, %v1252_v15, %v1342_v18 }
 0x297   : > { %v1257_v23 = vadd.f32 %v2937_v13, %v1256_v22  ;;  %v1357_v24 = vsel %vm1325_vm1, %v1247_v17, %v1341_v20  ;;  %vm1736_vm1 = vcmask 72704  }
 0x298   : > { %v1344_v25 = vmul.f32 0.01, %v1262_v21  ;;  %2000 = vmatprep.mubr.msk.f32.mxu1 %vm1382_vm2, %v1357_v24  ;;  %vm1328_vm3 = vcmp.gt.f32.partialorder %v1262_v21, 0.0 }
 0x299   : > { %vm1327_vm4 = vcmp.gt.f32.partialorder %v1257_v23, 0.0  ;;  %v1343_v27 = vmul.f32 0.01, %v1257_v23  ;;  %v1980_v28 = vpop.f32.mrb[4].mxu0  ;;  %2001 = vmatmul.mubr.msk.f32.vlgmr.msra.gmra.mrb[0].mxu1 %vm1382_vm2, %v1358_v26 }
 0x29a   : > { %v1272_v29 = vadd.f32 %v1980_v28, %v2937_v13  ;;  %v1266_v30 = vpop.f32.mrb[5].mxu0  ;;  %v1360_v34 = vsel %vm1328_vm3, %v1262_v21, %v1344_v25 }
 0x29b   : > { %v1267_v31 = vadd.f32 %v2937_v13, %v1266_v30  ;;  %v1359_v32 = vsel %vm1327_vm4, %v1257_v23, %v1343_v27 }
 0x29c   : > { %v1346_v33 = vmul.f32 0.01, %v1272_v29  ;;  %2003 = vmatprep.mubr.msk.f32.mxu1 %vm1382_vm2, %v1359_v32  ;;  %vm1330_vm5 = vcmp.gt.f32.partialorder %v1272_v29, 0.0 }
 0x29d   : > { %vm1329_vm6 = vcmp.gt.f32.partialorder %v1267_v31, 0.0  ;;  %v1345_v35 = vmul.f32 0.01, %v1267_v31  ;;  %v1983_v36 = vpop.f32.mrb[6].mxu0  ;;  %2004 = vmatmul.mubr.msk.f32.gmra.mrb[2].mxu1 %vm1382_vm2, %v1360_v34 }
 0x29e   : > { %v1282_v37 = vadd.f32 %v1983_v36, %v2937_v13  ;;  %v1276_v38 = vpop.f32.mrb[7].mxu0  ;;  %v1362_v42 = vsel %vm1330_vm5, %v1272_v29, %v1346_v33 }
 0x29f   : > { %v1277_v39 = vadd.f32 %v2937_v13, %v1276_v38  ;;  %v1361_v40 = vsel %vm1329_vm6, %v1267_v31, %v1345_v35 }
 0x2a0   : > { %v1348_v41 = vmul.f32 0.01, %v1282_v37  ;;  %2006 = vmatprep.mubr.msk.f32.mxu1 %vm1382_vm2, %v1361_v40  ;;  %vm1332_vm7 = vcmp.gt.f32.partialorder %v1282_v37, 0.0 }
 0x2a1   : > { %vm1331_vm8 = vcmp.gt.f32.partialorder %v1277_v39, 0.0  ;;  %v1347_v43 = vmul.f32 0.01, %v1277_v39  ;;  %v1986_v44 = vpop.f32.mrb[8].mxu0  ;;  %2007 = vmatmul.mubr.msk.f32.gmra.mrb[4].mxu1 %vm1382_vm2, %v1362_v42 }
 0x2a2   : > { %v1292_v45 = vadd.f32 %v1986_v44, %v2937_v13  ;;  %v1286_v46 = vpop.f32.mrb[9].mxu0  ;;  %v1364_v50 = vsel %vm1332_vm7, %v1282_v37, %v1348_v41 }
 0x2a3   : > { %v1287_v47 = vadd.f32 %v2937_v13, %v1286_v46  ;;  %v1363_v48 = vsel %vm1331_vm8, %v1277_v39, %v1347_v43 }
 0x2a4   : > { %v1350_v49 = vmul.f32 0.01, %v1292_v45  ;;  %2009 = vmatprep.mubr.msk.f32.mxu1 %vm1382_vm2, %v1363_v48  ;;  %vm1334_vm9 = vcmp.gt.f32.partialorder %v1292_v45, 0.0 }
 0x2a5   : > { %vm1333_vm10 = vcmp.gt.f32.partialorder %v1287_v47, 0.0  ;;  %v1349_v51 = vmul.f32 0.01, %v1287_v47  ;;  %v1989_v52 = vpop.f32.mrb[10].mxu0  ;;  %2010 = vmatmul.mubr.msk.f32.gmra.mrb[6].mxu1 %vm1382_vm2, %v1364_v50 }
 0x2a6   : > { %v1302_v53 = vadd.f32 %v1989_v52, %v2937_v13  ;;  %v1296_v54 = vpop.f32.mrb[11].mxu0  ;;  %v1366_v58 = vsel %vm1334_vm9, %v1292_v45, %v1350_v49 }
 0x2a7   : > { %v1297_v55 = vadd.f32 %v2937_v13, %v1296_v54  ;;  %v1365_v56 = vsel %vm1333_vm10, %v1287_v47, %v1349_v51 }
 0x2a8   : > { %v1352_v57 = vmul.f32 0.01, %v1302_v53  ;;  %2012 = vmatprep.mubr.msk.f32.mxu1 %vm1382_vm2, %v1365_v56  ;;  %vm1336_vm11 = vcmp.gt.f32.partialorder %v1302_v53, 0.0 }
 0x2a9   : > { %vm1335_vm12 = vcmp.gt.f32.partialorder %v1297_v55, 0.0  ;;  %v1351_v60 = vmul.f32 0.01, %v1297_v55  ;;  %v1992_v61 = vpop.f32.mrb[12].mxu0  ;;  %2013 = vmatmul.mubr.msk.f32.gmra.mrb[8].mxu1 %vm1382_vm2, %v1366_v58 }
 0x2aa   : > { %v1312_v62 = vadd.f32 %v1992_v61, %v2937_v13  ;;  %v1306_v63 = vpop.f32.mrb[13].mxu0  ;;  %v1368_v3 = vsel %vm1336_vm11, %v1302_v53, %v1352_v57 }
 0x2ab   : > { %v1307_v0 = vadd.f32 %v2937_v13, %v1306_v63  ;;  %v1367_v1 = vsel %vm1335_vm12, %v1297_v55, %v1351_v60 }
 0x2ac   : > { %v1354_v2 = vmul.f32 0.01, %v1312_v62  ;;  %2015 = vmatprep.mubr.msk.f32.mxu1 %vm1382_vm2, %v1367_v1  ;;  %vm1338_vm13 = vcmp.gt.f32.partialorder %v1312_v62, 0.0 }
 0x2ad   : > { %vm1337_vm14 = vcmp.gt.f32.partialorder %v1307_v0, 0.0  ;;  %v1353_v4 = vmul.f32 0.01, %v1307_v0  ;;  %v1995_v5 = vpop.f32.mrb[14].mxu0  ;;  %2016 = vmatmul.mubr.msk.f32.gmra.mrb[10].mxu1 %vm1382_vm2, %v1368_v3 }
 0x2ae   : > { %v1322_v6 = vadd.f32 %v1995_v5, %v2937_v13  ;;  %v1316_v7 = vpop.f32.mrb[15].mxu0  ;;  %v1370_v11 = vsel %vm1338_vm13, %v1312_v62, %v1354_v2 }
 0x2af   : > { %v1317_v8 = vadd.f32 %v2937_v13, %v1316_v7  ;;  %v1369_v9 = vsel %vm1337_vm14, %v1307_v0, %v1353_v4  ;;  %v2974_v13 = vld [vmem:[%s3141_s6] ss:$0 sm:$0xff] }
 0x2b0   : > { %v1356_v10 = vmul.f32 0.01, %v1322_v6  ;;  %2018 = vmatprep.mubr.msk.f32.mxu1 %vm1382_vm2, %v1369_v9  ;;  %vm1340_vm15 = vcmp.gt.f32.partialorder %v1322_v6, 0.0 }
 0x2b1   : > { %vm1339_vm0 = vcmp.gt.f32.partialorder %v1317_v8, 0.0  ;;  %v1355_v59 = vmul.f32 0.01, %v1317_v8  ;;  %2019 = vmatmul.mubr.msk.f32.gmra.mrb[12].mxu1 %vm1382_vm2, %v1370_v11 }
 0x2b2   : > { %v1372_v14 = vsel %vm1340_vm15, %v1322_v6, %v1356_v10 }
 0x2b3   : > { %v1371_v12 = vsel %vm1339_vm0, %v1317_v8, %v1355_v59 }
 0x2b4   : > { %2021 = vmatprep.mubr.msk.f32.mxu1 %vm1382_vm2, %v1371_v12 }
 0x2b5   : > { %2022 = vmatmul.mubr.msk.f32.gmra.mrb[14].mxu1 %vm1382_vm2, %v1372_v14 }
 0x36c   : > { %v2002_v15 = vpop.f32.mrb[0].mxu1 }
 0x36d   : > { %v2977_v16 = vadd.f32 %v2002_v15, %v2974_v13  ;;  %v1497_v17 = vpop.f32.mrb[1].mxu1 }
 0x36e   : > { %v2980_v18 = vadd.f32 %v2974_v13, %v1497_v17 }
 0x36f   : > { %v1577_v19 = vand.u32 2147483647, %v2977_v16  ;;  %vm1641_vm2 = vcmp.ge.f32.partialorder %v2977_v16, 0.0 }
 0x370   : > { %v1576_v20 = vand.u32 2147483647, %v2980_v18  ;;  %v2005_v21 = vpop.f32.mrb[2].mxu1  ;;  %vm1640_vm3 = vcmp.ge.f32.partialorder %v2980_v18, 0.0 }
 0x371   : > { %v1593_v22 = vsub.f32 0.0, %v1577_v19  ;;  %v2985_v23 = vadd.f32 %v2005_v21, %v2974_v13  ;;  %v1507_v24 = vpop.f32.mrb[3].mxu1 }
 0x372   : > { %v1592_v25 = vsub.f32 0.0, %v1576_v20  ;;  %v2988_v26 = vadd.f32 %v2974_v13, %v1507_v24 }
 0x373   : > { %v1610_v27 = vmul.f32 1.442695, %v1593_v22  ;;  %v1579_v28 = vand.u32 2147483647, %v2985_v23  ;;  %vm1643_vm4 = vcmp.ge.f32.partialorder %v2985_v23, 0.0 }
 0x374   : > { %v1608_v29 = vmul.f32 1.442695, %v1592_v25  ;;  %v1578_v30 = vand.u32 2147483647, %v2988_v26  ;;  %v2008_v31 = vpop.f32.mrb[4].mxu1  ;;  %vm1642_vm5 = vcmp.ge.f32.partialorder %v2988_v26, 0.0 }
 0x375   : > { %2277 = vpow2.f32 %v1610_v27  ;;  %v1595_v32 = vsub.f32 0.0, %v1579_v28  ;;  %v2993_v33 = vadd.f32 %v2008_v31, %v2974_v13  ;;  %v1517_v34 = vpop.f32.mrb[5].mxu1 }
 0x376   : > { %2279 = vpow2.f32 %v1608_v29  ;;  %v1594_v35 = vsub.f32 0.0, %v1578_v30  ;;  %v2996_v36 = vadd.f32 %v2974_v13, %v1517_v34 }
 0x377   : > { %v1614_v37 = vmul.f32 1.442695, %v1595_v32  ;;  %v1581_v38 = vand.u32 2147483647, %v2993_v33  ;;  %vm1645_vm6 = vcmp.ge.f32.partialorder %v2993_v33, 0.0 }
 0x378   : > { %v1612_v39 = vmul.f32 1.442695, %v1594_v35  ;;  %v1580_v40 = vand.u32 2147483647, %v2996_v36  ;;  %v2011_v41 = vpop.f32.mrb[6].mxu1  ;;  %vm1644_vm7 = vcmp.ge.f32.partialorder %v2996_v36, 0.0 }
 0x379   : > { %2281 = vpow2.f32 %v1614_v37  ;;  %v1597_v42 = vsub.f32 0.0, %v1581_v38  ;;  %v3001_v43 = vadd.f32 %v2011_v41, %v2974_v13  ;;  %v1527_v44 = vpop.f32.mrb[7].mxu1 }
 0x37a   : > { %2283 = vpow2.f32 %v1612_v39  ;;  %v1596_v45 = vsub.f32 0.0, %v1580_v40  ;;  %v3004_v46 = vadd.f32 %v2974_v13, %v1527_v44 }
 0x37b   : > { %v1618_v47 = vmul.f32 1.442695, %v1597_v42  ;;  %v1583_v48 = vand.u32 2147483647, %v3001_v43  ;;  %vm1647_vm8 = vcmp.ge.f32.partialorder %v3001_v43, 0.0 }
 0x37c   : > { %v1616_v49 = vmul.f32 1.442695, %v1596_v45  ;;  %v1582_v50 = vand.u32 2147483647, %v3004_v46  ;;  %v2014_v51 = vpop.f32.mrb[8].mxu1  ;;  %vm1646_vm9 = vcmp.ge.f32.partialorder %v3004_v46, 0.0 }
 0x37d   : > { %2285 = vpow2.f32 %v1618_v47  ;;  %v1599_v52 = vsub.f32 0.0, %v1583_v48  ;;  %v3009_v53 = vadd.f32 %v2014_v51, %v2974_v13  ;;  %v1537_v54 = vpop.f32.mrb[9].mxu1 }
 0x37e   : > { %2287 = vpow2.f32 %v1616_v49  ;;  %v1598_v55 = vsub.f32 0.0, %v1582_v50  ;;  %v3012_v56 = vadd.f32 %v2974_v13, %v1537_v54 }
 0x37f   : > { %v2278_v57 = vpop.eup %2277  ;;  %v1622_v58 = vmul.f32 1.442695, %v1599_v52  ;;  %v1585_v60 = vand.u32 2147483647, %v3009_v53  ;;  %vm1649_vm10 = vcmp.ge.f32.partialorder %v3009_v53, 0.0 }
 0x380   : > { %v2280_v61 = vpop.eup %2279  ;;  %v1657_v62 = vadd.f32 1.0, %v2278_v57  ;;  %v1620_v63 = vmul.f32 1.442695, %v1598_v55  ;;  %v1584_v0 = vand.u32 2147483647, %v3012_v56  ;;  %v2017_v3 = vpop.f32.mrb[10].mxu1 }
 0x381   : > { %v1656_v1 = vadd.f32 1.0, %v2280_v61  ;;  %2289 = vpow2.f32 %v1622_v58  ;;  %v1601_v2 = vsub.f32 0.0, %v1585_v60  ;;  %v3017_v5 = vadd.f32 %v2017_v3, %v2974_v13  ;;  %v1547_v6 = vpop.f32.mrb[11].mxu1 }
 0x382   : > { %2291 = vrcp.f32 %v1657_v62  ;;  %v1600_v4 = vsub.f32 0.0, %v1584_v0  ;;  %v3022_v9 = vadd.f32 %v2974_v13, %v1547_v6  ;;  %vm1648_vm11 = vcmp.ge.f32.partialorder %v3012_v56, 0.0 }
 0x383   : > { %v3019_v7 = vpop.eup %2281  ;;  %2293 = vrcp.f32 %v1656_v1  ;;  %v1626_v8 = vmul.f32 1.442695, %v1601_v2  ;;  %v1587_v12 = vand.u32 2147483647, %v3017_v5  ;;  %vm1651_vm12 = vcmp.ge.f32.partialorder %v3017_v5, 0.0 }
 0x384   : > { %v3024_v10 = vpop.eup %2283  ;;  %v1659_v11 = vadd.f32 1.0, %v3019_v7  ;;  %2295 = vpow2.f32 %v1620_v63  ;;  %v1624_v59 = vmul.f32 1.442695, %v1600_v4  ;;  %v2020_v14 = vpop.f32.mrb[12].mxu1  ;;  %v1586_v17 = vand.u32 2147483647, %v3022_v9 }
 0x385   : > { %v1658_v15 = vadd.f32 1.0, %v3024_v10  ;;  %2297 = vpow2.f32 %v1626_v8  ;;  %v1557_v19 = vpop.f32.mrb[13].mxu1  ;;  %v1603_v20 = vsub.f32 0.0, %v1587_v12  ;;  %v3031_v21 = vadd.f32 %v2020_v14, %v2974_v13 }
 0x386   : > { %2299 = vrcp.f32 %v1659_v11  ;;  %v1602_v24 = vsub.f32 0.0, %v1586_v17  ;;  %v3036_v25 = vadd.f32 %v2974_v13, %v1557_v19  ;;  %vm1650_vm13 = vcmp.ge.f32.partialorder %v3022_v9, 0.0 }
 0x387   : > { %v3033_v22 = vpop.eup %2285  ;;  %2301 = vrcp.f32 %v1658_v15  ;;  %v1630_v29 = vmul.f32 1.442695, %v1603_v20  ;;  %v1589_v30 = vand.u32 2147483647, %v3031_v21  ;;  %vm1653_vm14 = vcmp.ge.f32.partialorder %v3031_v21, 0.0 }
 0x388   : > { %v3038_v27 = vpop.eup %2287  ;;  %v1661_v28 = vadd.f32 1.0, %v3033_v22  ;;  %2303 = vpow2.f32 %v1624_v59  ;;  %v2023_v31 = vpop.f32.mrb[14].mxu1  ;;  %v1628_v34 = vmul.f32 1.442695, %v1602_v24  ;;  %v1588_v35 = vand.u32 2147483647, %v3036_v25 }
 0x389   : > { %v1660_v32 = vadd.f32 1.0, %v3038_v27  ;;  %v1605_v37 = vsub.f32 0.0, %v1589_v30  ;;  %v3045_v38 = vadd.f32 %v2023_v31, %v2974_v13  ;;  %v1567_v39 = vpop.f32.mrb[15].mxu1  ;;  %vm1652_vm15 = vcmp.ge.f32.partialorder %v3036_v25, 0.0 }
 0x38a   : > { %2305 = vrcp.f32 %v1661_v28  ;;  %v1604_v41 = vsub.f32 0.0, %v1588_v35  ;;  %v3050_v42 = vadd.f32 %v2974_v13, %v1567_v39 }
 0x38b   : > { %v3047_v40 = vpop.eup %2289  ;;  %2307 = vrcp.f32 %v1660_v32  ;;  %v1634_v47 = vmul.f32 1.442695, %v1605_v37  ;;  %v1591_v48 = vand.u32 2147483647, %v3045_v38  ;;  %vm1655_vm0 = vcmp.ge.f32.partialorder %v3045_v38, 0.0 }
 0x38c   : > { %v2292_v44 = vpop.eup %2291  ;;  %v1663_v45 = vadd.f32 1.0, %v3047_v40  ;;  %2309 = vpow2.f32 %v1630_v29  ;;  %v1632_v51 = vmul.f32 1.442695, %v1604_v41  ;;  %v1590_v55 = vand.u32 2147483647, %v3050_v42 }
 0x38d   : > { %v2294_v49 = vpop.eup %2293  ;;  %v1705_v50 = vmul.f32 %v2292_v44, %v2278_v57  ;;  %2311 = vpow2.f32 %v1628_v34  ;;  %v1607_v13 = vsub.f32 0.0, %v1591_v48 }
 0x38e   : > { %v2296_v52 = vpop.eup %2295  ;;  %v1704_v54 = vmul.f32 %v2294_v49, %v2280_v61  ;;  %2313 = vrcp.f32 %v1663_v45  ;;  %v1606_v2 = vsub.f32 0.0, %v1590_v55 }
 0x38f   : > { %v2298_v58 = vpop.eup %2297  ;;  %v1721_v60 = vsel %vm1641_vm2, %v2292_v44, %v1705_v50  ;;  %v1662_v62 = vadd.f32 1.0, %v2296_v52  ;;  %2315 = vpow2.f32 %v1634_v47  ;;  %v1638_v0 = vmul.f32 1.442695, %v1607_v13 }
 0x390   : > { %v2300_v63 = vpop.eup %2299  ;;  %1738 = vst.msk [vmem:[%s2755_s21 + $0x8] sm:$0xff] %vm1736_vm1, %v1721_v60  ;;  %v1720_v16 = vsel %vm1640_vm3, %v2294_v49, %v1704_v54  ;;  %v1665_v57 = vadd.f32 1.0, %v2298_v58  ;;  %2317 = vpow2.f32 %v1632_v51  ;;  %v1636_v8 = vmul.f32 1.442695, %v1606_v2 }
 0x391   : > { %v2302_v61 = vpop.eup %2301  ;;  %1737 = vst.msk [vmem:[%s2755_s21] sm:$0xff] %vm1736_vm1, %v1720_v16  ;;  %v1707_v1 = vmul.f32 %v2300_v63, %v3019_v7  ;;  %2319 = vrcp.f32 %v1662_v62  ;;  %vm1654_vm2 = vcmp.ge.f32.partialorder %v3050_v42, 0.0 }
 0x392   : > { %v2304_v3 = vpop.eup %2303  ;;  %v1706_v18 = vmul.f32 %v2302_v61, %v3024_v10  ;;  %2321 = vrcp.f32 %v1665_v57 }
 0x393   : > { %v1723_v4 = vsel %vm1643_vm4, %v2300_v63, %v1707_v1  ;;  %v1664_v6 = vadd.f32 1.0, %v2304_v3  ;;  %2323 = vpow2.f32 %v1638_v0 }
 0x394   : > { %v2306_v11 = vpop.eup %2305  ;;  %1740 = vst.msk [vmem:[%s2755_s21 + $0x18] sm:$0xff] %vm1736_vm1, %v1723_v4  ;;  %v1722_v7 = vsel %vm1642_vm5, %v2302_v61, %v1706_v18 }
 0x395   : > { %v2308_v59 = vpop.eup %2307  ;;  %1739 = vst.msk [vmem:[%s2755_s21 + $0x10] sm:$0xff] %vm1736_vm1, %v1722_v7  ;;  %v1709_v23 = vmul.f32 %v2306_v11, %v3033_v22  ;;  %2325 = vrcp.f32 %v1664_v6 }
 0x396   : > { %v2310_v26 = vpop.eup %2309  ;;  %v1708_v10 = vmul.f32 %v2308_v59, %v3038_v27  ;;  %2327 = vpow2.f32 %v1636_v8 }
 0x397   : > { %v2312_v12 = vpop.eup %2311  ;;  %v1725_v14 = vsel %vm1645_vm6, %v2306_v11, %v1709_v23  ;;  %v1667_v15 = vadd.f32 1.0, %v2310_v26 }
 0x398   : > { %v2314_v17 = vpop.eup %2313  ;;  %1742 = vst.msk [vmem:[%s2755_s21 + $0x28] sm:$0xff] %vm1736_vm1, %v1725_v14  ;;  %v1724_v19 = vsel %vm1644_vm7, %v2308_v59, %v1708_v10  ;;  %v1666_v20 = vadd.f32 1.0, %v2312_v12 }
 0x399   : > { %v2316_v24 = vpop.eup %2315  ;;  %1741 = vst.msk [vmem:[%s2755_s21 + $0x20] sm:$0xff] %vm1736_vm1, %v1724_v19  ;;  %v1711_v22 = vmul.f32 %v2314_v17, %v3047_v40  ;;  %2329 = vrcp.f32 %v1667_v15 }
 0x39a   : > { %v2318_v33 = vpop.eup %2317  ;;  %2331 = vrcp.f32 %v1666_v20  ;;  %v1669_v27 = vadd.f32 1.0, %v2316_v24 }
 0x39b   : > { %v2320_v36 = vpop.eup %2319  ;;  %v1727_v28 = vsel %vm1647_vm8, %v2314_v17, %v1711_v22  ;;  %v1668_v29 = vadd.f32 1.0, %v2318_v33 }
 0x39c   : > { %v2322_v30 = vpop.eup %2321  ;;  %1744 = vst.msk [vmem:[%s2755_s21 + $0x38] sm:$0xff] %vm1736_vm1, %v1727_v28  ;;  %v1710_v31 = vmul.f32 %v2320_v36, %v2296_v52  ;;  %2333 = vrcp.f32 %v1669_v27 }
 0x39d   : > { %v2324_v32 = vpop.eup %2323  ;;  %v1713_v34 = vmul.f32 %v2322_v30, %v2298_v58  ;;  %2335 = vrcp.f32 %v1668_v29 }
 0x39e   : > { %v1726_v35 = vsel %vm1646_vm9, %v2320_v36, %v1710_v31  ;;  %v1671_v43 = vadd.f32 1.0, %v2324_v32 }
 0x39f   : > { %v2326_v37 = vpop.eup %2325  ;;  %1743 = vst.msk [vmem:[%s2755_s21 + $0x30] sm:$0xff] %vm1736_vm1, %v1726_v35  ;;  %v1729_v39 = vsel %vm1649_vm10, %v2322_v30, %v1713_v34 }
 0x3a0   : > { %v2328_v40 = vpop.eup %2327  ;;  %1746 = vst.msk [vmem:[%s2755_s21 + $0x48] sm:$0xff] %vm1736_vm1, %v1729_v39  ;;  %v1712_v41 = vmul.f32 %v2326_v37, %v2304_v3  ;;  %2337 = vrcp.f32 %v1671_v43 }
 0x3a1   : > { %v1670_v46 = vadd.f32 1.0, %v2328_v40 }
 0x3a2   : > { %v1728_v44 = vsel %vm1648_vm11, %v2326_v37, %v1712_v41 }
 0x3a3   : > { %v2330_v45 = vpop.eup %2329  ;;  %1745 = vst.msk [vmem:[%s2755_s21 + $0x40] sm:$0xff] %vm1736_vm1, %v1728_v44  ;;  %2339 = vrcp.f32 %v1670_v46 }
 0x3a4   : > { %v2332_v53 = vpop.eup %2331  ;;  %v1715_v47 = vmul.f32 %v2330_v45, %v2310_v26 }
 0x3a5   : > { %v1714_v48 = vmul.f32 %v2332_v53, %v2312_v12 }
 0x3a6   : > { %v2334_v49 = vpop.eup %2333  ;;  %v1731_v50 = vsel %vm1651_vm12, %v2330_v45, %v1715_v47 }
 0x3a7   : > { %v2336_v51 = vpop.eup %2335  ;;  %1748 = vst.msk [vmem:[%s2755_s21 + $0x58] sm:$0xff] %vm1736_vm1, %v1731_v50  ;;  %v1730_v56 = vsel %vm1650_vm13, %v2332_v53, %v1714_v48  ;;  %v1717_v52 = vmul.f32 %v2334_v49, %v2316_v24 }
 0x3a8   : > { %1747 = vst.msk [vmem:[%s2755_s21 + $0x50] sm:$0xff] %vm1736_vm1, %v1730_v56  ;;  %v1716_v54 = vmul.f32 %v2336_v51, %v2318_v33 }
 0x3a9   : > { %v1733_v13 = vsel %vm1653_vm14, %v2334_v49, %v1717_v52 }
 0x3aa   : > { %v2338_v5 = vpop.eup %2337  ;;  %1750 = vst.msk [vmem:[%s2755_s21 + $0x68] sm:$0xff] %vm1736_vm1, %v1733_v13  ;;  %v1732_v55 = vsel %vm1652_vm15, %v2336_v51, %v1716_v54 }
 0x3ab   : > { %1749 = vst.msk [vmem:[%s2755_s21 + $0x60] sm:$0xff] %vm1736_vm1, %v1732_v55  ;;  %v1719_v9 = vmul.f32 %v2338_v5, %v2324_v32 }
 0x3ad   : > { %v2340_v58 = vpop.eup %2339  ;;  %v1735_v60 = vsel %vm1655_vm0, %v2338_v5, %v1719_v9 }
 0x3ae   : > { %1752 = vst.msk [vmem:[%s2755_s21 + $0x78] sm:$0xff] %vm1736_vm1, %v1735_v60  ;;  %v1718_v62 = vmul.f32 %v2340_v58, %v2328_v40 }
 0x3b0   : > { %v1734_v21 = vsel %vm1654_vm2, %v2340_v58, %v1718_v62 }
 0x3b1   : > { %1751 = vst.msk [vmem:[%s2755_s21 + $0x70] sm:$0xff] %vm1736_vm1, %v1734_v21 }
 0x3b2 PF: > { %s17_s9 = sadd.s32 1, %s2411_s9   ;;  %s3149_s19 = sld [smem:[#allocation5_spill]] }
 0x3b3   : > { %p14_p2 = scmp.ge.s32.totalorder %s17_s9, 6   ;;  %s3150_s22 = sld [smem:[#allocation6_spill]] }
 0x3b4   : > { %s3151_s24 = smov %s2383_s25  ;;  %s3152_s25 = smov %s2519_s15 }
 0x3b5   : > { %s3153_s26 = smov %s2391_s27  ;;  %s3154_s27 = smov %s2529_s20 }
 0x3b6   : > { %s3155_s28 = smov %s2403_s30  ;;  %s3156_s29 = smov %s2407_s8 }
 0x3b7   :  { %16 = sbr.rel (!%p14_p2) target bundleno = 5 (0x5), region = 145 }
 0x3b8   : > { %s3157_s30 = smov %s3149_s19 }
 0x3b9   : > { %s3158_s8 = smov %s3150_s22 }

</bundles_post_ra>
